<compile_context>
chip_gen: v5e
topology: v5e:2x2
jax: 0.10.0
libtpu: 0.0.40
codegen_flags: <defaults>
</compile_context>

<pallas_src>
import math

import jax
import jax.numpy as jnp
from jax.experimental import pallas as pl
from jax.experimental.pallas import tpu as pltpu

DIMS = [28 * 28, 512, 256, 128, 64, 32, 10]
HIDDEN = DIMS[1:-1]                       # [512, 256, 128, 64, 32]
EPS = 1e-5
NEG_SLOPE = 0.01

# 128-lane-aligned offsets for the packed (gamma | beta | b6) vector slab.
_PAD = [((n + 127) // 128) * 128 for n in HIDDEN]       # [512,256,128,128,128]
VEC_OFFSETS = [0]
for _p in _PAD[:-1]:
    VEC_OFFSETS.append(VEC_OFFSETS[-1] + _p)
VEC_WIDTH = VEC_OFFSETS[-1] + _PAD[-1]                  # 1152

# bf16 weights + f32 packed vector slab.
PARAM_BYTES = sum(DIMS[i] * DIMS[i + 1] for i in range(6)) * 2 + 3 * VEC_WIDTH * 4
# Generous per-row live-activation estimate (bf16 input + widest f32
# intermediate + bf16 carry + padded f32 output), x3 for temporaries.
ACT_BYTES_PER_ROW = 3 * (2 * DIMS[0] + 4 * HIDDEN[0] + 2 * HIDDEN[0] + 4 * 128)


def classifier_kernel(x_ref, w1, w2, w3, w4, w5, w6, vec_ref, o_ref):
    """vec_ref rows: 0 = gammas (concat), 1 = betas (concat), 2 = b6 (first 10)."""
    h = x_ref[...]                        # (B, 784) bf16 (cast at JAX boundary)
    vec = vec_ref[...]                    # (3, VEC_WIDTH) f32, single tiny load

    w_refs = (w1, w2, w3, w4, w5)
    for i, n in enumerate(HIDDEN):
        off = VEC_OFFSETS[i]
        # Linear (bias omitted: cancelled exactly by BN mean-subtraction).
        # bf16 x bf16 on the MXU, f32 accumulate.
        y = jnp.dot(h, w_refs[i][...], preferred_element_type=jnp.float32)
        # BatchNorm1d (training mode, biased var) folded into scale/shift.
        mean = jnp.mean(y, axis=0, keepdims=True)
        var = jnp.mean(y * y, axis=0, keepdims=True) - mean * mean
        var = jnp.maximum(var, 0.0)       # guard against f32 cancellation -> NaN
        inv_std = jax.lax.rsqrt(var + EPS)
        scale = vec[0:1, off:off + n] * inv_std
        shift = vec[1:2, off:off + n] - mean * scale
        y = y * scale + shift
        # LeakyReLU(0.01): max(y, 0.01*y) is exact for slope in [0,1].
        # Carry the activation across the layer boundary in bf16.
        h = jnp.maximum(y, NEG_SLOPE * y).astype(jnp.bfloat16)

    # Final Linear(32,10) + bias -> tanh -> softmax(dim=1).
    b6 = vec[2:3, 0:DIMS[-1]]
    z = jnp.dot(h, w6[...], preferred_element_type=jnp.float32) + b6
    z = jnp.tanh(z)
    # tanh bounds z to [-1, 1]: exp cannot overflow, skip max-subtraction.
    e = jnp.exp(z)
    o_ref[...] = e / jnp.sum(e, axis=1, keepdims=True)


def init_params(key):
    """PyTorch-style init: Linear W,b ~ U(-1/sqrt(fan_in), +); BN gamma=1, beta=0.
    Weights are stored as bf16 (MXU-native).  Hidden biases b1..b5 are not
    materialized because training-mode BN cancels them exactly."""
    weights = []
    gamma_row, beta_row = [], []
    b6 = None
    for i in range(6):
        key, kw, kb = jax.random.split(key, 3)
        fan_in, fan_out = DIMS[i], DIMS[i + 1]
        bound = 1.0 / math.sqrt(fan_in)
        W = jax.random.uniform(kw, (fan_in, fan_out), jnp.float32, -bound, bound)
        weights.append(W.astype(jnp.bfloat16))
        if i < 5:
            pad = _PAD[i]
            gamma_row.append(jnp.ones((fan_out,), jnp.float32))
            gamma_row.append(jnp.zeros((pad - fan_out,), jnp.float32))
            beta_row.append(jnp.zeros((pad,), jnp.float32))
        else:
            b6 = jax.random.uniform(kb, (fan_out,), jnp.float32, -bound, bound)
    vec = jnp.stack([
        jnp.concatenate(gamma_row),
        jnp.concatenate(beta_row),
        jnp.concatenate([b6, jnp.zeros((VEC_WIDTH - DIMS[-1],), jnp.float32)]),
    ], axis=0)                                              # (3, VEC_WIDTH)
    return tuple(weights), vec


@jax.jit
def classifier_forward(x, weights, vec):
    B = x.shape[0]
    # Feed the kernel bf16 input (numerically identical to casting before the
    # first dot inside the kernel, but halves the (B,784) DMA + VMEM).
    x = x.astype(jnp.bfloat16)
    # Explicit VMEM budget: params + resident batch + slack, within the v7x
    # 64 MiB physical ceiling (leave headroom for compiler scratch).
    vmem_bytes = PARAM_BYTES + B * ACT_BYTES_PER_ROW + (4 << 20)
    vmem_bytes = max(8 << 20, min(vmem_bytes, 56 << 20))
    vmem = pl.BlockSpec(memory_space=pltpu.MemorySpace.VMEM)
    return pl.pallas_call(
        classifier_kernel,
        out_shape=jax.ShapeDtypeStruct((B, DIMS[-1]), jnp.float32),
        in_specs=[vmem] * (1 + len(weights) + 1),
        out_specs=vmem,
        compiler_params=pltpu.CompilerParams(vmem_limit_bytes=vmem_bytes),
    )(x, *weights, vec)


# ---------------- pure-JAX references for validation ----------------

def reference_matched(x, weights, vec):
    """Same math as the kernel (bf16 input/carry, folded BN, max-LeakyReLU)."""
    h = x.astype(jnp.bfloat16)
    for i, n in enumerate(HIDDEN):
        off = VEC_OFFSETS[i]
        y = jnp.dot(h, weights[i], preferred_element_type=jnp.float32)
        mean = jnp.mean(y, axis=0, keepdims=True)
        var = jnp.maximum(jnp.mean(y * y, axis=0, keepdims=True) - mean * mean, 0.0)
        inv_std = jax.lax.rsqrt(var + EPS)
        scale = vec[0:1, off:off + n] * inv_std
        shift = vec[1:2, off:off + n] - mean * scale
        y = y * scale + shift
        h = jnp.maximum(y, NEG_SLOPE * y).astype(jnp.bfloat16)
    z = jnp.tanh(jnp.dot(h, weights[5], preferred_element_type=jnp.float32)
                 + vec[2:3, 0:DIMS[-1]])
    e = jnp.exp(z)
    return e / jnp.sum(e, axis=1, keepdims=True)


def reference_literal_f32(x, weights, vec):
    """Literal PyTorch-style math in f32 (two-pass BN, max-sub softmax)."""
    h = x
    for i, n in enumerate(HIDDEN):
        off = VEC_OFFSETS[i]
        y = h @ weights[i].astype(jnp.float32)   # hidden bias cancels under BN
        mean = jnp.mean(y, axis=0, keepdims=True)
        var = jnp.mean((y - mean) ** 2, axis=0, keepdims=True)
        y = (y - mean) * jax.lax.rsqrt(var + EPS)
        y = y * vec[0, off:off + n] + vec[1, off:off + n]
        h = jnp.where(y >= 0.0, y, NEG_SLOPE * y)
    z = jnp.tanh(h @ weights[5].astype(jnp.float32) + vec[2, 0:DIMS[-1]])
    z = z - jnp.max(z, axis=1, keepdims=True)
    e = jnp.exp(z)
    return e / jnp.sum(e, axis=1, keepdims=True)


if __name__ == "__main__":
    key = jax.random.PRNGKey(0)
    key, kx, kp = jax.random.split(key, 3)

    # Small demo batch (multiple of 8).  For real throughput, batch requests
    # so B >= 128 (v5e) / 256 (v6e, v7x); BN stats require the whole batch in
    # one call, which this resident design supports up to VMEM limits.
    B = 8
    x = jax.random.normal(kx, (B, 28 * 28), jnp.float32)
    weights, vec = init_params(kp)

    out = classifier_forward(x, weights, vec)
    jax.block_until_ready(out)

    assert out.shape == (B, DIMS[-1])
    assert bool(jnp.all(jnp.isfinite(out)))
    # softmax rows must sum to 1 (exact division in the kernel)
    assert jnp.allclose(jnp.sum(out, axis=1), jnp.ones((B,)), atol=1e-5)

    ref_m = reference_matched(x, weights, vec)
    assert jnp.allclose(out, ref_m, atol=2e-3), float(jnp.max(jnp.abs(out - ref_m)))

    # literal-spec f32 path: only differs by the bf16 weight/activation casts
    ref_f32 = reference_literal_f32(x, weights, vec)
    assert jnp.allclose(out, ref_f32, atol=2e-2), float(jnp.max(jnp.abs(out - ref_f32)))

    print("KERNEL_OK")
</pallas_src>

<mosaic_0001>
module attributes {stable_mosaic.version = 11 : i64} {
  func.func @classifier_kernel(%arg0: memref<8x784xbf16, #tpu.memory_space<vmem>>, %arg1: memref<784x512xbf16, #tpu.memory_space<vmem>>, %arg2: memref<512x256xbf16, #tpu.memory_space<vmem>>, %arg3: memref<256x128xbf16, #tpu.memory_space<vmem>>, %arg4: memref<128x64xbf16, #tpu.memory_space<vmem>>, %arg5: memref<64x32xbf16, #tpu.memory_space<vmem>>, %arg6: memref<32x10xbf16, #tpu.memory_space<vmem>>, %arg7: memref<3x1152xf32, #tpu.memory_space<vmem>>, %arg8: memref<8x10xf32, #tpu.memory_space<vmem>>) attributes {dimension_semantics = [], scalar_prefetch = 0 : i64, scratch_operands = 0 : i64, tpu.core_type = #tpu.core_type<tc>} {
    %c0 = arith.constant 0 : index
    %c0_0 = arith.constant 0 : index
    %0 = vector.load %arg0[%c0, %c0_0] : memref<8x784xbf16, #tpu.memory_space<vmem>>, vector<8x784xbf16>
    %c0_1 = arith.constant 0 : index
    %c0_2 = arith.constant 0 : index
    %1 = vector.load %arg7[%c0_1, %c0_2] : memref<3x1152xf32, #tpu.memory_space<vmem>>, vector<3x1152xf32>
    %c0_3 = arith.constant 0 : index
    %c0_4 = arith.constant 0 : index
    %2 = vector.load %arg1[%c0_3, %c0_4] : memref<784x512xbf16, #tpu.memory_space<vmem>>, vector<784x512xbf16>
    %cst = arith.constant dense<0.000000e+00> : vector<8x512xf32>
    %3 = tpu.matmul %0, %2, %cst {dimension_numbers = #tpu.dot_dimension_numbers<[1], [0], [0], [1], [0, 0, 1, 1], [], []>} : vector<8x784xbf16>, vector<784x512xbf16>, vector<8x512xf32> -> vector<8x512xf32>
    %cst_5 = arith.constant dense<0.000000e+00> : vector<512xf32>
    %4 = vector.multi_reduction <add>, %3, %cst_5 [0] : vector<8x512xf32> to vector<512xf32>
    %5 = vector.shape_cast %4 : vector<512xf32> to vector<1x512xf32>
    %cst_6 = arith.constant 8.000000e+00 : f32
    %6 = vector.broadcast %cst_6 : f32 to vector<1x512xf32>
    %7 = arith.divf %5, %6 : vector<1x512xf32>
    %8 = arith.mulf %3, %3 : vector<8x512xf32>
    %cst_7 = arith.constant dense<0.000000e+00> : vector<512xf32>
    %9 = vector.multi_reduction <add>, %8, %cst_7 [0] : vector<8x512xf32> to vector<512xf32>
    %10 = vector.shape_cast %9 : vector<512xf32> to vector<1x512xf32>
    %cst_8 = arith.constant 8.000000e+00 : f32
    %11 = vector.broadcast %cst_8 : f32 to vector<1x512xf32>
    %12 = arith.divf %10, %11 : vector<1x512xf32>
    %13 = arith.mulf %7, %7 : vector<1x512xf32>
    %14 = arith.subf %12, %13 : vector<1x512xf32>
    %cst_9 = arith.constant 0.000000e+00 : f32
    %15 = vector.broadcast %cst_9 : f32 to vector<1x512xf32>
    %16 = arith.maximumf %14, %15 : vector<1x512xf32>
    %cst_10 = arith.constant 9.99999974E-6 : f32
    %17 = vector.broadcast %cst_10 : f32 to vector<1x512xf32>
    %18 = arith.addf %16, %17 : vector<1x512xf32>
    %19 = math.rsqrt %18 : vector<1x512xf32>
    %20 = vector.extract_strided_slice %1 {offsets = [0, 0], sizes = [1, 512], strides = [1, 1]} : vector<3x1152xf32> to vector<1x512xf32>
    %21 = arith.mulf %20, %19 : vector<1x512xf32>
    %22 = vector.extract_strided_slice %1 {offsets = [1, 0], sizes = [1, 512], strides = [1, 1]} : vector<3x1152xf32> to vector<1x512xf32>
    %23 = arith.mulf %7, %21 : vector<1x512xf32>
    %24 = arith.subf %22, %23 : vector<1x512xf32>
    %25 = vector.broadcast %21 : vector<1x512xf32> to vector<8x512xf32>
    %26 = arith.mulf %3, %25 : vector<8x512xf32>
    %27 = vector.broadcast %24 : vector<1x512xf32> to vector<8x512xf32>
    %28 = arith.addf %26, %27 : vector<8x512xf32>
    %cst_11 = arith.constant 0.00999999977 : f32
    %29 = vector.broadcast %cst_11 : f32 to vector<8x512xf32>
    %30 = arith.mulf %29, %28 : vector<8x512xf32>
    %31 = arith.maximumf %28, %30 : vector<8x512xf32>
    %32 = arith.truncf %31 : vector<8x512xf32> to vector<8x512xbf16>
    %c0_12 = arith.constant 0 : index
    %c0_13 = arith.constant 0 : index
    %33 = vector.load %arg2[%c0_12, %c0_13] : memref<512x256xbf16, #tpu.memory_space<vmem>>, vector<512x256xbf16>
    %cst_14 = arith.constant dense<0.000000e+00> : vector<8x256xf32>
    %34 = tpu.matmul %32, %33, %cst_14 {dimension_numbers = #tpu.dot_dimension_numbers<[1], [0], [0], [1], [0, 0, 1, 1], [], []>} : vector<8x512xbf16>, vector<512x256xbf16>, vector<8x256xf32> -> vector<8x256xf32>
    %cst_15 = arith.constant dense<0.000000e+00> : vector<256xf32>
    %35 = vector.multi_reduction <add>, %34, %cst_15 [0] : vector<8x256xf32> to vector<256xf32>
    %36 = vector.shape_cast %35 : vector<256xf32> to vector<1x256xf32>
    %cst_16 = arith.constant 8.000000e+00 : f32
    %37 = vector.broadcast %cst_16 : f32 to vector<1x256xf32>
    %38 = arith.divf %36, %37 : vector<1x256xf32>
    %39 = arith.mulf %34, %34 : vector<8x256xf32>
    %cst_17 = arith.constant dense<0.000000e+00> : vector<256xf32>
    %40 = vector.multi_reduction <add>, %39, %cst_17 [0] : vector<8x256xf32> to vector<256xf32>
    %41 = vector.shape_cast %40 : vector<256xf32> to vector<1x256xf32>
    %cst_18 = arith.constant 8.000000e+00 : f32
    %42 = vector.broadcast %cst_18 : f32 to vector<1x256xf32>
    %43 = arith.divf %41, %42 : vector<1x256xf32>
    %44 = arith.mulf %38, %38 : vector<1x256xf32>
    %45 = arith.subf %43, %44 : vector<1x256xf32>
    %cst_19 = arith.constant 0.000000e+00 : f32
    %46 = vector.broadcast %cst_19 : f32 to vector<1x256xf32>
    %47 = arith.maximumf %45, %46 : vector<1x256xf32>
    %cst_20 = arith.constant 9.99999974E-6 : f32
    %48 = vector.broadcast %cst_20 : f32 to vector<1x256xf32>
    %49 = arith.addf %47, %48 : vector<1x256xf32>
    %50 = math.rsqrt %49 : vector<1x256xf32>
    %51 = vector.extract_strided_slice %1 {offsets = [0, 512], sizes = [1, 256], strides = [1, 1]} : vector<3x1152xf32> to vector<1x256xf32>
    %52 = arith.mulf %51, %50 : vector<1x256xf32>
    %53 = vector.extract_strided_slice %1 {offsets = [1, 512], sizes = [1, 256], strides = [1, 1]} : vector<3x1152xf32> to vector<1x256xf32>
    %54 = arith.mulf %38, %52 : vector<1x256xf32>
    %55 = arith.subf %53, %54 : vector<1x256xf32>
    %56 = vector.broadcast %52 : vector<1x256xf32> to vector<8x256xf32>
    %57 = arith.mulf %34, %56 : vector<8x256xf32>
    %58 = vector.broadcast %55 : vector<1x256xf32> to vector<8x256xf32>
    %59 = arith.addf %57, %58 : vector<8x256xf32>
    %cst_21 = arith.constant 0.00999999977 : f32
    %60 = vector.broadcast %cst_21 : f32 to vector<8x256xf32>
    %61 = arith.mulf %60, %59 : vector<8x256xf32>
    %62 = arith.maximumf %59, %61 : vector<8x256xf32>
    %63 = arith.truncf %62 : vector<8x256xf32> to vector<8x256xbf16>
    %c0_22 = arith.constant 0 : index
    %c0_23 = arith.constant 0 : index
    %64 = vector.load %arg3[%c0_22, %c0_23] : memref<256x128xbf16, #tpu.memory_space<vmem>>, vector<256x128xbf16>
    %cst_24 = arith.constant dense<0.000000e+00> : vector<8x128xf32>
    %65 = tpu.matmul %63, %64, %cst_24 {dimension_numbers = #tpu.dot_dimension_numbers<[1], [0], [0], [1], [0, 0, 1, 1], [], []>} : vector<8x256xbf16>, vector<256x128xbf16>, vector<8x128xf32> -> vector<8x128xf32>
    %cst_25 = arith.constant dense<0.000000e+00> : vector<128xf32>
    %66 = vector.multi_reduction <add>, %65, %cst_25 [0] : vector<8x128xf32> to vector<128xf32>
    %67 = vector.shape_cast %66 : vector<128xf32> to vector<1x128xf32>
    %cst_26 = arith.constant 8.000000e+00 : f32
    %68 = vector.broadcast %cst_26 : f32 to vector<1x128xf32>
    %69 = arith.divf %67, %68 : vector<1x128xf32>
    %70 = arith.mulf %65, %65 : vector<8x128xf32>
    %cst_27 = arith.constant dense<0.000000e+00> : vector<128xf32>
    %71 = vector.multi_reduction <add>, %70, %cst_27 [0] : vector<8x128xf32> to vector<128xf32>
    %72 = vector.shape_cast %71 : vector<128xf32> to vector<1x128xf32>
    %cst_28 = arith.constant 8.000000e+00 : f32
    %73 = vector.broadcast %cst_28 : f32 to vector<1x128xf32>
    %74 = arith.divf %72, %73 : vector<1x128xf32>
    %75 = arith.mulf %69, %69 : vector<1x128xf32>
    %76 = arith.subf %74, %75 : vector<1x128xf32>
    %cst_29 = arith.constant 0.000000e+00 : f32
    %77 = vector.broadcast %cst_29 : f32 to vector<1x128xf32>
    %78 = arith.maximumf %76, %77 : vector<1x128xf32>
    %cst_30 = arith.constant 9.99999974E-6 : f32
    %79 = vector.broadcast %cst_30 : f32 to vector<1x128xf32>
    %80 = arith.addf %78, %79 : vector<1x128xf32>
    %81 = math.rsqrt %80 : vector<1x128xf32>
    %82 = vector.extract_strided_slice %1 {offsets = [0, 768], sizes = [1, 128], strides = [1, 1]} : vector<3x1152xf32> to vector<1x128xf32>
    %83 = arith.mulf %82, %81 : vector<1x128xf32>
    %84 = vector.extract_strided_slice %1 {offsets = [1, 768], sizes = [1, 128], strides = [1, 1]} : vector<3x1152xf32> to vector<1x128xf32>
    %85 = arith.mulf %69, %83 : vector<1x128xf32>
    %86 = arith.subf %84, %85 : vector<1x128xf32>
    %87 = vector.broadcast %83 : vector<1x128xf32> to vector<8x128xf32>
    %88 = arith.mulf %65, %87 : vector<8x128xf32>
    %89 = vector.broadcast %86 : vector<1x128xf32> to vector<8x128xf32>
    %90 = arith.addf %88, %89 : vector<8x128xf32>
    %cst_31 = arith.constant 0.00999999977 : f32
    %91 = vector.broadcast %cst_31 : f32 to vector<8x128xf32>
    %92 = arith.mulf %91, %90 : vector<8x128xf32>
    %93 = arith.maximumf %90, %92 : vector<8x128xf32>
    %94 = arith.truncf %93 : vector<8x128xf32> to vector<8x128xbf16>
    %c0_32 = arith.constant 0 : index
    %c0_33 = arith.constant 0 : index
    %95 = vector.load %arg4[%c0_32, %c0_33] : memref<128x64xbf16, #tpu.memory_space<vmem>>, vector<128x64xbf16>
    %cst_34 = arith.constant dense<0.000000e+00> : vector<8x64xf32>
    %96 = tpu.matmul %94, %95, %cst_34 {dimension_numbers = #tpu.dot_dimension_numbers<[1], [0], [0], [1], [0, 0, 1, 1], [], []>} : vector<8x128xbf16>, vector<128x64xbf16>, vector<8x64xf32> -> vector<8x64xf32>
    %cst_35 = arith.constant dense<0.000000e+00> : vector<64xf32>
    %97 = vector.multi_reduction <add>, %96, %cst_35 [0] : vector<8x64xf32> to vector<64xf32>
    %98 = vector.shape_cast %97 : vector<64xf32> to vector<1x64xf32>
    %cst_36 = arith.constant 8.000000e+00 : f32
    %99 = vector.broadcast %cst_36 : f32 to vector<1x64xf32>
    %100 = arith.divf %98, %99 : vector<1x64xf32>
    %101 = arith.mulf %96, %96 : vector<8x64xf32>
    %cst_37 = arith.constant dense<0.000000e+00> : vector<64xf32>
    %102 = vector.multi_reduction <add>, %101, %cst_37 [0] : vector<8x64xf32> to vector<64xf32>
    %103 = vector.shape_cast %102 : vector<64xf32> to vector<1x64xf32>
    %cst_38 = arith.constant 8.000000e+00 : f32
    %104 = vector.broadcast %cst_38 : f32 to vector<1x64xf32>
    %105 = arith.divf %103, %104 : vector<1x64xf32>
    %106 = arith.mulf %100, %100 : vector<1x64xf32>
    %107 = arith.subf %105, %106 : vector<1x64xf32>
    %cst_39 = arith.constant 0.000000e+00 : f32
    %108 = vector.broadcast %cst_39 : f32 to vector<1x64xf32>
    %109 = arith.maximumf %107, %108 : vector<1x64xf32>
    %cst_40 = arith.constant 9.99999974E-6 : f32
    %110 = vector.broadcast %cst_40 : f32 to vector<1x64xf32>
    %111 = arith.addf %109, %110 : vector<1x64xf32>
    %112 = math.rsqrt %111 : vector<1x64xf32>
    %113 = vector.extract_strided_slice %1 {offsets = [0, 896], sizes = [1, 64], strides = [1, 1]} : vector<3x1152xf32> to vector<1x64xf32>
    %114 = arith.mulf %113, %112 : vector<1x64xf32>
    %115 = vector.extract_strided_slice %1 {offsets = [1, 896], sizes = [1, 64], strides = [1, 1]} : vector<3x1152xf32> to vector<1x64xf32>
    %116 = arith.mulf %100, %114 : vector<1x64xf32>
    %117 = arith.subf %115, %116 : vector<1x64xf32>
    %118 = vector.broadcast %114 : vector<1x64xf32> to vector<8x64xf32>
    %119 = arith.mulf %96, %118 : vector<8x64xf32>
    %120 = vector.broadcast %117 : vector<1x64xf32> to vector<8x64xf32>
    %121 = arith.addf %119, %120 : vector<8x64xf32>
    %cst_41 = arith.constant 0.00999999977 : f32
    %122 = vector.broadcast %cst_41 : f32 to vector<8x64xf32>
    %123 = arith.mulf %122, %121 : vector<8x64xf32>
    %124 = arith.maximumf %121, %123 : vector<8x64xf32>
    %125 = arith.truncf %124 : vector<8x64xf32> to vector<8x64xbf16>
    %c0_42 = arith.constant 0 : index
    %c0_43 = arith.constant 0 : index
    %126 = vector.load %arg5[%c0_42, %c0_43] : memref<64x32xbf16, #tpu.memory_space<vmem>>, vector<64x32xbf16>
    %cst_44 = arith.constant dense<0.000000e+00> : vector<8x32xf32>
    %127 = tpu.matmul %125, %126, %cst_44 {dimension_numbers = #tpu.dot_dimension_numbers<[1], [0], [0], [1], [0, 0, 1, 1], [], []>} : vector<8x64xbf16>, vector<64x32xbf16>, vector<8x32xf32> -> vector<8x32xf32>
    %cst_45 = arith.constant dense<0.000000e+00> : vector<32xf32>
    %128 = vector.multi_reduction <add>, %127, %cst_45 [0] : vector<8x32xf32> to vector<32xf32>
    %129 = vector.shape_cast %128 : vector<32xf32> to vector<1x32xf32>
    %cst_46 = arith.constant 8.000000e+00 : f32
    %130 = vector.broadcast %cst_46 : f32 to vector<1x32xf32>
    %131 = arith.divf %129, %130 : vector<1x32xf32>
    %132 = arith.mulf %127, %127 : vector<8x32xf32>
    %cst_47 = arith.constant dense<0.000000e+00> : vector<32xf32>
    %133 = vector.multi_reduction <add>, %132, %cst_47 [0] : vector<8x32xf32> to vector<32xf32>
    %134 = vector.shape_cast %133 : vector<32xf32> to vector<1x32xf32>
    %cst_48 = arith.constant 8.000000e+00 : f32
    %135 = vector.broadcast %cst_48 : f32 to vector<1x32xf32>
    %136 = arith.divf %134, %135 : vector<1x32xf32>
    %137 = arith.mulf %131, %131 : vector<1x32xf32>
    %138 = arith.subf %136, %137 : vector<1x32xf32>
    %cst_49 = arith.constant 0.000000e+00 : f32
    %139 = vector.broadcast %cst_49 : f32 to vector<1x32xf32>
    %140 = arith.maximumf %138, %139 : vector<1x32xf32>
    %cst_50 = arith.constant 9.99999974E-6 : f32
    %141 = vector.broadcast %cst_50 : f32 to vector<1x32xf32>
    %142 = arith.addf %140, %141 : vector<1x32xf32>
    %143 = math.rsqrt %142 : vector<1x32xf32>
    %144 = vector.extract_strided_slice %1 {offsets = [0, 1024], sizes = [1, 32], strides = [1, 1]} : vector<3x1152xf32> to vector<1x32xf32>
    %145 = arith.mulf %144, %143 : vector<1x32xf32>
    %146 = vector.extract_strided_slice %1 {offsets = [1, 1024], sizes = [1, 32], strides = [1, 1]} : vector<3x1152xf32> to vector<1x32xf32>
    %147 = arith.mulf %131, %145 : vector<1x32xf32>
    %148 = arith.subf %146, %147 : vector<1x32xf32>
    %149 = vector.broadcast %145 : vector<1x32xf32> to vector<8x32xf32>
    %150 = arith.mulf %127, %149 : vector<8x32xf32>
    %151 = vector.broadcast %148 : vector<1x32xf32> to vector<8x32xf32>
    %152 = arith.addf %150, %151 : vector<8x32xf32>
    %cst_51 = arith.constant 0.00999999977 : f32
    %153 = vector.broadcast %cst_51 : f32 to vector<8x32xf32>
    %154 = arith.mulf %153, %152 : vector<8x32xf32>
    %155 = arith.maximumf %152, %154 : vector<8x32xf32>
    %156 = arith.truncf %155 : vector<8x32xf32> to vector<8x32xbf16>
    %157 = vector.extract_strided_slice %1 {offsets = [2, 0], sizes = [1, 10], strides = [1, 1]} : vector<3x1152xf32> to vector<1x10xf32>
    %c0_52 = arith.constant 0 : index
    %c0_53 = arith.constant 0 : index
    %158 = vector.load %arg6[%c0_52, %c0_53] : memref<32x10xbf16, #tpu.memory_space<vmem>>, vector<32x10xbf16>
    %cst_54 = arith.constant dense<0.000000e+00> : vector<8x10xf32>
    %159 = tpu.matmul %156, %158, %cst_54 {dimension_numbers = #tpu.dot_dimension_numbers<[1], [0], [0], [1], [0, 0, 1, 1], [], []>} : vector<8x32xbf16>, vector<32x10xbf16>, vector<8x10xf32> -> vector<8x10xf32>
    %160 = vector.broadcast %157 : vector<1x10xf32> to vector<8x10xf32>
    %161 = arith.addf %159, %160 : vector<8x10xf32>
    %162 = math.tanh %161 : vector<8x10xf32>
    %163 = math.exp %162 : vector<8x10xf32>
    %cst_55 = arith.constant dense<0.000000e+00> : vector<8xf32>
    %164 = vector.multi_reduction <add>, %163, %cst_55 [1] : vector<8x10xf32> to vector<8xf32>
    %165 = vector.shape_cast %164 : vector<8xf32> to vector<8x1xf32>
    %166 = vector.broadcast %165 : vector<8x1xf32> to vector<8x10xf32>
    %167 = arith.divf %163, %166 : vector<8x10xf32>
    %c0_56 = arith.constant 0 : index
    %c0_57 = arith.constant 0 : index
    %168 = vector.load %arg8[%c0_56, %c0_57] : memref<8x10xf32, #tpu.memory_space<vmem>>, vector<8x10xf32>
    tpu.vector_store %arg8[%c0_56, %c0_57], %167 {strides = array<i32>} : memref<8x10xf32, #tpu.memory_space<vmem>>, vector<8x10xf32>,
    return
  }
}

</mosaic_0001>

<bundles_post_ra>
// kernel: classifier_forward.1
= control target key start
LH: loop header
LB: loop body
LE: loop exit
PB: predicated region body
PF: predicated region fallthrough
CT: control target
= control target key end

     0   :  { %13 = vsyncpa [#allocation3], 0  ;;  %s4865_s0 = inlined_call_operand.vmem [shape: bf16[8,784], index: 0, kind: input, shape index: {}]   ;;  %s4866_s1 = inlined_call_operand.hbm [shape: bf16[784,512], index: 1, kind: input, shape index: {}]   ;;  %s4867_s2 = inlined_call_operand.hbm [shape: bf16[512,256], index: 2, kind: input, shape index: {}]   ;;  %s4868_s3 = inlined_call_operand.hbm [shape: bf16[256,128], index: 3, kind: input, shape index: {}]   ;;  %s4869_s4 = inlined_call_operand.vmem [shape: bf16[128,64], index: 4, kind: input, shape index: {}]   ;;  %s4870_s5 = inlined_call_operand.vmem [shape: bf16[64,32], index: 5, kind: input, shape index: {}]   ;;  %s4871_s6 = inlined_call_operand.vmem [shape: bf16[32,10], index: 6, kind: input, shape index: {}]   ;;  %s4872_s7 = inlined_call_operand.vmem [shape: f32[3,1152], index: 7, kind: input, shape index: {}]   ;;  %s4873_s8 = inlined_call_operand.hbm [shape: f32[8,10], index: 8, kind: output, shape index: {}]  }
   0x1   :  { %14 = vsyncpa [#allocation6], 0  ;;  %s35_s29 = sshll.u32 %s4867_s2, 4  ;;  %s36_s29 = int_to_ptr.hbm [resolvable:$true] %s35_s29 }
   0x2   :  { %15 = vsyncpa [#allocation4], 0  ;;  %s4526_s30 = smov [#allocation5]   ;;  %s22_s12 = sshll.u32 %s4866_s1, 4  ;;  %s23_s12 = int_to_ptr.hbm [resolvable:$true] %s22_s12 }
   0x3   :  { %s37_s9 = sshll.u32 %s4526_s30, 4  ;;  %s4527_s13 = smov 128   ;;  %s38_s9 = int_to_ptr.vmem [resolvable:$true] %s37_s9 }
   0x4   :  { %s4528_s14 = smov 8   ;;  %s4529_s15 = smov [#allocation2]  }
   0x5   :  { %43 = dma.hbm_to_vmem [thread:$0]  %s36_s29, 8192, %s38_s9, [#allocation6], %s4527_s13, %s4527_s13, %s4528_s14  }
   0x6   :  { %s24_s16 = sshll.u32 %s4529_s15, 4  ;;  %s4530_s17 = smov 256   ;;  %s25_s16 = int_to_ptr.vmem [resolvable:$true] %s24_s16 }
   0x7   :  { %s4531_s18 = smov 16   ;;  %s48_s20 = sshll.u32 %s4868_s3, 4  ;;  %s49_s20 = int_to_ptr.hbm [resolvable:$true] %s48_s20 }
   0x8   :  { %30 = dma.hbm_to_vmem [thread:$0]  %s23_s12, 25088, %s25_s16, [#allocation3], %s4530_s17, %s4530_s17, %s4531_s18  }
   0x9   :  { %s4532_s21 = smov [#allocation7]   ;;  %s4533_s23 = smov 64  }
   0xa   :  { %s50_s22 = sshll.u32 %s4532_s21, 4  ;;  %s4534_s1 = smov 4   ;;  %s51_s22 = int_to_ptr.vmem [resolvable:$true] %s50_s22 }
   0xb   :  { %56 = dma.hbm_to_vmem [thread:$0]  %s49_s20, 2048, %s51_s22, [#allocation6], %s4533_s23, %s4533_s23, %s4534_s1  }
   0xc   :  { %4520 = dma.done.wait [#allocation3], 25088  }
   0xd   :  { %4521 = vsyncadd [#allocation3], 4294942208 }
   0xe   :  { %4522 = dma.done.wait [#allocation6], 10240  }
   0xf   :  { %4523 = vsyncadd [#allocation6], 4294957056  ;;  %v3044_v0 = vld [vmem:[#allocation2 + $0xe0] sm:$0xf]  ;;  %v4126_v1 = vld [vmem:[#allocation2 + $0xec] sm:$0xf0] }
  0x10   :  { %v3172_v2 = vld [vmem:[#allocation2 + $0x1e0] sm:$0xf]  ;;  %v3045_v3 = vor.u32 %v4126_v1, %v3044_v0  ;;  %v4158_v4 = vld [vmem:[#allocation2 + $0x1ec] sm:$0xf0]  ;;  %vm1287_vm0 = vcmask 130048   ;;  %vm1784_vm6 = vcmask 1043456  }
  0x11   :  { %v3300_v5 = vld [vmem:[#allocation2 + $0x2e0] sm:$0xf]  ;;  %v4190_v6 = vld [vmem:[#allocation2 + $0x2ec] sm:$0xf0]  ;;  %v3173_v7 = vor.u32 %v4158_v4, %v3172_v2  ;;  %s2919_s21 = sshll.u32 %s4873_s8, 4  ;;  %s2920_s21 = int_to_ptr.hbm [resolvable:$true] %s2919_s21 }
  0x12   :  { %v3301_v8 = vor.u32 %v4190_v6, %v3300_v5  ;;  %v3428_v9 = vld [vmem:[#allocation2 + $0x3e0] sm:$0xf]  ;;  %v4222_v10 = vld [vmem:[#allocation2 + $0x3ec] sm:$0xf0]  ;;  %1291 = vmatpush.bf16.msra.mxu0 %v3045_v3 }
  0x13   :  { %v3028_v11 = vld [vmem:[#allocation2 + $0xc0] sm:$0xf]  ;;  %v3429_v12 = vor.u32 %v4222_v10, %v3428_v9  ;;  %v4122_v13 = vld [vmem:[#allocation2 + $0xcc] sm:$0xf0]  ;;  %1304 = vmatpush.bf16.msra.mxu1 %v3173_v7 }
  0x14   :  { %v3156_v14 = vld [vmem:[#allocation2 + $0x1c0] sm:$0xf]  ;;  %v4154_v15 = vld [vmem:[#allocation2 + $0x1cc] sm:$0xf0]  ;;  %1317 = vmatpush.bf16.msra.mxu2 %v3301_v8  ;;  %v3029_v16 = vor.u32 %v4122_v13, %v3028_v11 }
  0x15   :  { %v3157_v17 = vor.u32 %v4154_v15, %v3156_v14  ;;  %v3284_v18 = vld [vmem:[#allocation2 + $0x2c0] sm:$0xf]  ;;  %v4186_v19 = vld [vmem:[#allocation2 + $0x2cc] sm:$0xf0]  ;;  %1330 = vmatpush.bf16.msra.mxu3 %v3429_v12 }
  0x16   :  { %v3412_v20 = vld [vmem:[#allocation2 + $0x3c0] sm:$0xf]  ;;  %v3285_v21 = vor.u32 %v4186_v19, %v3284_v18  ;;  %v4218_v22 = vld [vmem:[#allocation2 + $0x3cc] sm:$0xf0]  ;;  %1292 = vmatpush.bf16.msra.mxu0 %v3029_v16 }
  0x17   :  { %v3012_v23 = vld [vmem:[#allocation2 + $0xa0] sm:$0xf]  ;;  %v4118_v24 = vld [vmem:[#allocation2 + $0xac] sm:$0xf0]  ;;  %v3413_v25 = vor.u32 %v4218_v22, %v3412_v20  ;;  %1305 = vmatpush.bf16.msra.mxu1 %v3157_v17 }
  0x18   :  { %v3140_v26 = vld [vmem:[#allocation2 + $0x1a0] sm:$0xf]  ;;  %v4150_v27 = vld [vmem:[#allocation2 + $0x1ac] sm:$0xf0]  ;;  %v3013_v29 = vor.u32 %v4118_v24, %v3012_v23  ;;  %1318 = vmatpush.bf16.msra.mxu2 %v3285_v21  ;;  %v79_v24 = vld [vmem:[%s4865_s0 + $0x8] sm:$0xff] }
  0x19   :  { %v3268_v28 = vld [vmem:[#allocation2 + $0x2a0] sm:$0xf]  ;;  %v4182_v30 = vld [vmem:[#allocation2 + $0x2ac] sm:$0xf0]  ;;  %v3141_v33 = vor.u32 %v4150_v27, %v3140_v26  ;;  %1331 = vmatpush.bf16.msra.mxu3 %v3413_v25 }
  0x1a   :  { %v3396_v31 = vld [vmem:[#allocation2 + $0x3a0] sm:$0xf]  ;;  %v4214_v32 = vld [vmem:[#allocation2 + $0x3ac] sm:$0xf0]  ;;  %v3269_v34 = vor.u32 %v4182_v30, %v3268_v28  ;;  %1293 = vmatpush.bf16.msra.mxu0 %v3013_v29 }
  0x1b   :  { %v2996_v35 = vld [vmem:[#allocation2 + $0x80] sm:$0xf]  ;;  %v4114_v36 = vld [vmem:[#allocation2 + $0x8c] sm:$0xf0]  ;;  %v3397_v38 = vor.u32 %v4214_v32, %v3396_v31  ;;  %1306 = vmatpush.bf16.msra.mxu1 %v3141_v33 }
  0x1c   :  { %v3124_v37 = vld [vmem:[#allocation2 + $0x180] sm:$0xf]  ;;  %v4146_v39 = vld [vmem:[#allocation2 + $0x18c] sm:$0xf0]  ;;  %v2997_v44 = vor.u32 %v4114_v36, %v2996_v35  ;;  %1319 = vmatpush.bf16.msra.mxu2 %v3269_v34  ;;  %v4124_v34 = vld [vmem:[#allocation2 + $0xe4] sm:$0xf]  ;;  %v289_v36 = vunpack.c.l.b16 %v79_v24 }
  0x1d   :  { %v3252_v40 = vld [vmem:[#allocation2 + $0x280] sm:$0xf]  ;;  %v4178_v41 = vld [vmem:[#allocation2 + $0x28c] sm:$0xf0]  ;;  %v3125_v45 = vor.u32 %v4146_v39, %v3124_v37  ;;  %1332 = vmatpush.bf16.msra.mxu3 %v3397_v38  ;;  %v3046_v35 = vld [vmem:[#allocation2 + $0xf0] sm:$0xf0] }
  0x1e   :  { %v3380_v42 = vld [vmem:[#allocation2 + $0x380] sm:$0xf]  ;;  %v4210_v43 = vld [vmem:[#allocation2 + $0x38c] sm:$0xf0]  ;;  %v3253_v46 = vor.u32 %v4178_v41, %v3252_v40  ;;  %1294 = vmatpush.bf16.msra.mxu0 %v2997_v44  ;;  %v290_v41 = vunpack.c.h.b16 %v79_v24  ;;  %v4156_v44 = vld [vmem:[#allocation2 + $0x1e4] sm:$0xf] }
  0x1f   :  { %v2980_v47 = vld [vmem:[#allocation2 + $0x60] sm:$0xf]  ;;  %v4110_v48 = vld [vmem:[#allocation2 + $0x6c] sm:$0xf0]  ;;  %v3381_v50 = vor.u32 %v4210_v43, %v3380_v42  ;;  %1307 = vmatpush.bf16.msra.mxu1 %v3125_v45  ;;  %v3174_v45 = vld [vmem:[#allocation2 + $0x1f0] sm:$0xf0] }
  0x20   :  { %v3108_v49 = vld [vmem:[#allocation2 + $0x160] sm:$0xf]  ;;  %v4142_v51 = vld [vmem:[#allocation2 + $0x16c] sm:$0xf0]  ;;  %v2981_v56 = vor.u32 %v4110_v48, %v2980_v47  ;;  %1320 = vmatpush.bf16.msra.mxu2 %v3253_v46  ;;  %v3049_v48 = vor.u32 %v4124_v34, %v3046_v35  ;;  %v2982_v34 = vld [vmem:[#allocation2 + $0x70] sm:$0xf0] }
  0x21   :  { %v3236_v52 = vld [vmem:[#allocation2 + $0x260] sm:$0xf]  ;;  %v4174_v53 = vld [vmem:[#allocation2 + $0x26c] sm:$0xf0]  ;;  %v3109_v57 = vor.u32 %v4142_v51, %v3108_v49  ;;  %1333 = vmatpush.bf16.msra.mxu3 %v3381_v50 }
  0x22   :  { %v3364_v54 = vld [vmem:[#allocation2 + $0x360] sm:$0xf]  ;;  %v4206_v55 = vld [vmem:[#allocation2 + $0x36c] sm:$0xf0]  ;;  %v3237_v58 = vor.u32 %v4174_v53, %v3236_v52  ;;  %1295 = vmatpush.bf16.msra.mxu0 %v2981_v56  ;;  %v4597_v53 = vpack.c.b16 %v289_v36, %v289_v36  ;;  %v3030_v56 = vld [vmem:[#allocation2 + $0xd0] sm:$0xf0] }
  0x23   :  { %v2964_v59 = vld [vmem:[#allocation2 + $0x40] sm:$0xf]  ;;  %v4106_v60 = vld [vmem:[#allocation2 + $0x4c] sm:$0xf0]  ;;  %v3365_v62 = vor.u32 %v4206_v55, %v3364_v54  ;;  %1308 = vmatpush.bf16.msra.mxu1 %v3109_v57  ;;  %v4120_v55 = vld [vmem:[#allocation2 + $0xc4] sm:$0xf] }
  0x24   :  { %v3092_v61 = vld [vmem:[#allocation2 + $0x140] sm:$0xf]  ;;  %v4138_v63 = vld [vmem:[#allocation2 + $0x14c] sm:$0xf0]  ;;  %v2965_v4 = vor.u32 %v4106_v60, %v2964_v59  ;;  %1321 = vmatpush.bf16.msra.mxu2 %v3237_v58  ;;  %v4599_v59 = vpack.c.b16 %v290_v41, %v290_v41 }
  0x25   :  { %v3220_v0 = vld [vmem:[#allocation2 + $0x240] sm:$0xf]  ;;  %v4170_v1 = vld [vmem:[#allocation2 + $0x24c] sm:$0xf0]  ;;  %v3093_v5 = vor.u32 %v4138_v63, %v3092_v61  ;;  %1334 = vmatpush.bf16.msra.mxu3 %v3365_v62  ;;  %v3177_v61 = vor.u32 %v4156_v44, %v3174_v45  ;;  %v4152_v63 = vld [vmem:[#allocation2 + $0x1c4] sm:$0xf] }
  0x26   :  { %v3348_v2 = vld [vmem:[#allocation2 + $0x340] sm:$0xf]  ;;  %v4202_v3 = vld [vmem:[#allocation2 + $0x34c] sm:$0xf0]  ;;  %v3221_v6 = vor.u32 %v4170_v1, %v3220_v0  ;;  %1296 = vmatpush.bf16.msra.mxu0 %v2965_v4  ;;  %v3158_v0 = vld [vmem:[#allocation2 + $0x1d0] sm:$0xf0] }
  0x27   :  { %v2948_v7 = vld [vmem:[#allocation2 + $0x20] sm:$0xf]  ;;  %v4102_v8 = vld [vmem:[#allocation2 + $0x2c] sm:$0xf0]  ;;  %v3349_v10 = vor.u32 %v4202_v3, %v3348_v2  ;;  %1309 = vmatpush.bf16.msra.mxu1 %v3093_v5  ;;  %v3033_v2 = vor.u32 %v4120_v55, %v3030_v56 }
  0x28   :  { %v3076_v9 = vld [vmem:[#allocation2 + $0x120] sm:$0xf]  ;;  %v4134_v11 = vld [vmem:[#allocation2 + $0x12c] sm:$0xf0]  ;;  %v2949_v16 = vor.u32 %v4102_v8, %v2948_v7  ;;  %1322 = vmatpush.bf16.msra.mxu2 %v3221_v6  ;;  %v4116_v7 = vld [vmem:[#allocation2 + $0xa4] sm:$0xf] }
  0x29   :  { %v3204_v12 = vld [vmem:[#allocation2 + $0x220] sm:$0xf]  ;;  %v4166_v13 = vld [vmem:[#allocation2 + $0x22c] sm:$0xf0]  ;;  %v3077_v20 = vor.u32 %v4134_v11, %v3076_v9  ;;  %1335 = vmatpush.bf16.msra.mxu3 %v3349_v10  ;;  %v3014_v8 = vld [vmem:[#allocation2 + $0xb0] sm:$0xf0]  ;;  %v3161_v10 = vor.u32 %v4152_v63, %v3158_v0 }
  0x2a   :  { %v3332_v14 = vld [vmem:[#allocation2 + $0x320] sm:$0xf]  ;;  %v4198_v15 = vld [vmem:[#allocation2 + $0x32c] sm:$0xf0]  ;;  %v3205_v21 = vor.u32 %v4166_v13, %v3204_v12  ;;  %1297 = vmatpush.bf16.msra.mxu0 %v2949_v16  ;;  %v4148_v12 = vld [vmem:[#allocation2 + $0x1a4] sm:$0xf] }
  0x2b   :  { %v2932_v17 = vld [vmem:[#allocation2] sm:$0xf]  ;;  %v4098_v18 = vld [vmem:[#allocation2 + $0xc] sm:$0xf0]  ;;  %v3333_v25 = vor.u32 %v4198_v15, %v3332_v14  ;;  %1310 = vmatpush.bf16.msra.mxu1 %v3077_v20  ;;  %v3142_v13 = vld [vmem:[#allocation2 + $0x1b0] sm:$0xf0]  ;;  %v3017_v15 = vor.u32 %v4116_v7, %v3014_v8 }
  0x2c   :  { %v3060_v19 = vld [vmem:[#allocation2 + $0x100] sm:$0xf]  ;;  %v4130_v22 = vld [vmem:[#allocation2 + $0x10c] sm:$0xf0]  ;;  %v2933_v32 = vor.u32 %v4098_v18, %v2932_v17  ;;  %1323 = vmatpush.bf16.msra.mxu2 %v3205_v21  ;;  %v4112_v20 = vld [vmem:[#allocation2 + $0x84] sm:$0xf] }
  0x2d   :  { %v3188_v23 = vld [vmem:[#allocation2 + $0x200] sm:$0xf]  ;;  %v4162_v26 = vld [vmem:[#allocation2 + $0x20c] sm:$0xf0]  ;;  %v3061_v37 = vor.u32 %v4130_v22, %v3060_v19  ;;  %1336 = vmatpush.bf16.msra.mxu3 %v3333_v25  ;;  %v2998_v21 = vld [vmem:[#allocation2 + $0x90] sm:$0xf0] }
  0x2e   :  { %v3316_v27 = vld [vmem:[#allocation2 + $0x300] sm:$0xf]  ;;  %v4194_v28 = vld [vmem:[#allocation2 + $0x30c] sm:$0xf0]  ;;  %v3189_v38 = vor.u32 %v4162_v26, %v3188_v23  ;;  %1298 = vmatpush.bf16.msra.mxu0 %v2933_v32  ;;  %v81_v22 = vld [vmem:[%s4865_s0 + $0x18] sm:$0xf]  ;;  %v3145_v23 = vor.u32 %v4148_v12, %v3142_v13 }
  0x2f   :  { %v3556_v29 = vld [vmem:[#allocation2 + $0x4e0] sm:$0xf]  ;;  %v4254_v30 = vld [vmem:[#allocation2 + $0x4ec] sm:$0xf0]  ;;  %v3317_v42 = vor.u32 %v4194_v28, %v3316_v27  ;;  %1311 = vmatpush.bf16.msra.mxu1 %v3061_v37  ;;  %v4144_v25 = vld [vmem:[#allocation2 + $0x184] sm:$0xf]  ;;  %v3001_v28 = vor.u32 %v4112_v20, %v2998_v21  ;;  %v293_v35 = vunpack.c.l.b16 %v81_v22 }
  0x30   :  { %v3684_v31 = vld [vmem:[#allocation2 + $0x5e0] sm:$0xf]  ;;  %v4286_v33 = vld [vmem:[#allocation2 + $0x5ec] sm:$0xf0]  ;;  %v3557_v43 = vor.u32 %v4254_v30, %v3556_v29  ;;  %1324 = vmatpush.bf16.msra.mxu2 %v3189_v38  ;;  %v3126_v26 = vld [vmem:[#allocation2 + $0x190] sm:$0xf0] }
  0x31   :  { %v3700_v39 = vld [vmem:[#allocation2 + $0x600] sm:$0xf]  ;;  %v4290_v40 = vld [vmem:[#allocation2 + $0x60c] sm:$0xf0]  ;;  %v3685_v47 = vor.u32 %v4286_v33, %v3684_v31  ;;  %1337 = vmatpush.bf16.msra.mxu3 %v3317_v42  ;;  %v4108_v33 = vld [vmem:[#allocation2 + $0x64] sm:$0xf]  ;;  %v3129_v36 = vor.u32 %v4144_v25, %v3126_v26 }
  0x32   :  { %v78_v46 = vld [vmem:[%s4865_s0] sm:$0xff]  ;;  %v4250_v50 = vld [vmem:[#allocation2 + $0x4cc] sm:$0xf0]  ;;  %v3701_v58 = vor.u32 %v4290_v40, %v3700_v39  ;;  %1343 = vmatpush.bf16.msrb.mxu0 %v3557_v43  ;;  %v3110_v39 = vld [vmem:[#allocation2 + $0x170] sm:$0xf0]  ;;  %v2985_v41 = vor.u32 %v4108_v33, %v2982_v34 }
  0x33   :  { %v3540_v49 = vld [vmem:[#allocation2 + $0x4c0] sm:$0xf]  ;;  %v287_v52 = vunpack.c.l.b16 %v78_v46  ;;  %v4282_v54 = vld [vmem:[#allocation2 + $0x5cc] sm:$0xf0]  ;;  %v288_v57 = vunpack.c.h.b16 %v78_v46  ;;  %1356 = vmatpush.bf16.msrb.mxu1 %v3685_v47  ;;  %1325 = vmatmul.bf16.vlgmr.msra.gmra.mxu2 %v4597_v53  ;;  %v4140_v38 = vld [vmem:[#allocation2 + $0x164] sm:$0xf] }
  0x34   :  { %v3668_v51 = vld [vmem:[#allocation2 + $0x5c0] sm:$0xf]  ;;  %v3541_v62 = vor.u32 %v4250_v50, %v3540_v49  ;;  %v4246_v4 = vld [vmem:[#allocation2 + $0x4ac] sm:$0xf0]  ;;  %1376 = vmatpush.bf16.msrb.mxu2 %v3701_v58  ;;  %1338 = vmatmul.bf16.vlgmr.msra.gmra.mxu3 %v4599_v59  ;;  %v4104_v46 = vld [vmem:[#allocation2 + $0x44] sm:$0xf]  ;;  %v3113_v49 = vor.u32 %v4140_v38, %v3110_v39 }
  0x35   :  { %v4601_v60 = vpack.c.b16 %v287_v52, %v287_v52  ;;  %1382 = vmatpush.bf16.msrb.mxu3 %v3049_v48  ;;  %v3669_v1 = vor.u32 %v4282_v54, %v3668_v51  ;;  %v3524_v3 = vld [vmem:[#allocation2 + $0x4a0] sm:$0xf]  ;;  %v4278_v6 = vld [vmem:[#allocation2 + $0x5ac] sm:$0xf0]  ;;  %v4605_v9 = vpack.c.b16 %v288_v57, %v288_v57  ;;  %v2966_v47 = vld [vmem:[#allocation2 + $0x50] sm:$0xf0]  ;;  %v4612_v48 = vpack.c.b16 %v293_v35, %v293_v35 }
  0x36   :  { %v3652_v5 = vld [vmem:[#allocation2 + $0x5a0] sm:$0xf]  ;;  %1344 = vmatpush.bf16.msrb.mxu0 %v3541_v62  ;;  %v3525_v11 = vor.u32 %v4246_v4, %v3524_v3  ;;  %v4242_v17 = vld [vmem:[#allocation2 + $0x48c] sm:$0xf0]  ;;  %v4136_v51 = vld [vmem:[#allocation2 + $0x144] sm:$0xf]  ;;  %v2969_v55 = vor.u32 %v4104_v46, %v2966_v47 }
  0x37   :  { %1299 = vmatmul.bf16.vlgmr.msra.gmra.mxu0 %v4601_v60  ;;  %1357 = vmatpush.bf16.msrb.mxu1 %v3669_v1  ;;  %v3653_v14 = vor.u32 %v4278_v6, %v3652_v5  ;;  %v3508_v16 = vld [vmem:[#allocation2 + $0x480] sm:$0xf]  ;;  %v4274_v19 = vld [vmem:[#allocation2 + $0x58c] sm:$0xf0]  ;;  %v3094_v52 = vld [vmem:[#allocation2 + $0x150] sm:$0xf0] }
  0x38   :  { %1395 = vmatpush.bf16.msra.mxu2 %v3177_v61  ;;  %v3636_v18 = vld [vmem:[#allocation2 + $0x580] sm:$0xf]  ;;  %1312 = vmatmul.bf16.vlgmr.msra.gmra.mxu1 %v4605_v9  ;;  %v3509_v24 = vor.u32 %v4242_v17, %v3508_v16  ;;  %v4238_v30 = vld [vmem:[#allocation2 + $0x46c] sm:$0xf0]  ;;  %v4100_v62 = vld [vmem:[#allocation2 + $0x24] sm:$0xf]  ;;  %v3097_v1 = vor.u32 %v4136_v51, %v3094_v52 }
  0x39   :  { %1383 = vmatpush.bf16.msrb.mxu3 %v3033_v2  ;;  %v3637_v27 = vor.u32 %v4274_v19, %v3636_v18  ;;  %v3492_v29 = vld [vmem:[#allocation2 + $0x460] sm:$0xf]  ;;  %v4270_v32 = vld [vmem:[#allocation2 + $0x56c] sm:$0xf0]  ;;  %v2950_v63 = vld [vmem:[#allocation2 + $0x30] sm:$0xf0] }
  0x3a   :  { %1345 = vmatpush.bf16.msrb.mxu0 %v3525_v11  ;;  %v3620_v31 = vld [vmem:[#allocation2 + $0x560] sm:$0xf]  ;;  %v3493_v37 = vor.u32 %v4238_v30, %v3492_v29  ;;  %v4234_v43 = vld [vmem:[#allocation2 + $0x44c] sm:$0xf0]  ;;  %v4132_v0 = vld [vmem:[#allocation2 + $0x124] sm:$0xf]  ;;  %v2953_v7 = vor.u32 %v4100_v62, %v2950_v63 }
  0x3b   :  { %1358 = vmatpush.bf16.msrb.mxu1 %v3653_v14  ;;  %v3621_v40 = vor.u32 %v4270_v32, %v3620_v31  ;;  %v3476_v42 = vld [vmem:[#allocation2 + $0x440] sm:$0xf]  ;;  %v4266_v45 = vld [vmem:[#allocation2 + $0x54c] sm:$0xf0]  ;;  %v3078_v3 = vld [vmem:[#allocation2 + $0x130] sm:$0xf0] }
  0x3c   :  { %1396 = vmatpush.bf16.msra.mxu2 %v3161_v10  ;;  %v3604_v44 = vld [vmem:[#allocation2 + $0x540] sm:$0xf]  ;;  %v3477_v50 = vor.u32 %v4234_v43, %v3476_v42  ;;  %v4230_v57 = vld [vmem:[#allocation2 + $0x42c] sm:$0xf0]  ;;  %v4096_v12 = vld [vmem:[#allocation2 + $0x4] sm:$0xf]  ;;  %v3081_v19 = vor.u32 %v4132_v0, %v3078_v3 }
  0x3d   :  { %1384 = vmatpush.bf16.msrb.mxu3 %v3017_v15  ;;  %v3605_v54 = vor.u32 %v4266_v45, %v3604_v44  ;;  %v3460_v56 = vld [vmem:[#allocation2 + $0x420] sm:$0xf]  ;;  %v4262_v61 = vld [vmem:[#allocation2 + $0x52c] sm:$0xf0]  ;;  %v2934_v13 = vld [vmem:[#allocation2 + $0x10] sm:$0xf0] }
  0x3e   :  { %1346 = vmatpush.bf16.msrb.mxu0 %v3509_v24  ;;  %v3588_v58 = vld [vmem:[#allocation2 + $0x520] sm:$0xf]  ;;  %v3461_v2 = vor.u32 %v4230_v57, %v3460_v56  ;;  %v80_v5 = vld [vmem:[%s4865_s0 + $0x10] sm:$0xff]  ;;  %v4188_v14 = vld [vmem:[#allocation2 + $0x2e4] sm:$0xf]  ;;  %v2937_v25 = vor.u32 %v4096_v12, %v2934_v13 }
  0x3f   :  { %1359 = vmatpush.bf16.msrb.mxu1 %v3637_v27  ;;  %v3444_v4 = vld [vmem:[#allocation2 + $0x400] sm:$0xf]  ;;  %v3589_v6 = vor.u32 %v4262_v61, %v3588_v58  ;;  %v4226_v8 = vld [vmem:[#allocation2 + $0x40c] sm:$0xf0]  ;;  %v3302_v15 = vld [vmem:[#allocation2 + $0x2f0] sm:$0xf0]  ;;  %v291_v18 = vunpack.c.l.b16 %v80_v5 }
  0x40   :  { %1397 = vmatpush.bf16.msra.mxu2 %v3145_v23  ;;  %v3572_v10 = vld [vmem:[#allocation2 + $0x500] sm:$0xf]  ;;  %v4258_v11 = vld [vmem:[#allocation2 + $0x50c] sm:$0xf0]  ;;  %v4220_v16 = vld [vmem:[#allocation2 + $0x3e4] sm:$0xf]  ;;  %v3445_v20 = vor.u32 %v4226_v8, %v3444_v4  ;;  %v292_v23 = vunpack.c.h.b16 %v80_v5 }
  0x41   :  { %1385 = vmatpush.bf16.msrb.mxu3 %v3001_v28  ;;  %v3430_v17 = vld [vmem:[#allocation2 + $0x3f0] sm:$0xf0]  ;;  %v4252_v21 = vld [vmem:[#allocation2 + $0x4e4] sm:$0xf]  ;;  %v3573_v24 = vor.u32 %v4258_v11, %v3572_v10  ;;  %v3305_v28 = vor.u32 %v4188_v14, %v3302_v15  ;;  %v4619_v34 = vpack.c.b16 %v291_v18, %v291_v18 }
  0x42   :  { %1347 = vmatpush.bf16.msrb.mxu0 %v3493_v37  ;;  %v3558_v22 = vld [vmem:[#allocation2 + $0x4f0] sm:$0xf0]  ;;  %v4128_v26 = vld [vmem:[#allocation2 + $0x104] sm:$0xf]  ;;  %v3433_v29 = vor.u32 %v4220_v16, %v3430_v17  ;;  %v4621_v39 = vpack.c.b16 %v292_v23, %v292_v23 }
  0x43   :  { %1360 = vmatpush.bf16.msrb.mxu1 %v3621_v40  ;;  %3714 = vmatmul.msk.bf16.vlgmr.msrb.gmra.mxu2 %vm1287_vm0, %v4612_v48  ;;  %v3062_v27 = vld [vmem:[#allocation2 + $0x110] sm:$0xf0]  ;;  %v4284_v30 = vld [vmem:[#allocation2 + $0x5e4] sm:$0xf]  ;;  %v3561_v33 = vor.u32 %v4252_v21, %v3558_v22 }
  0x44   :  { %1398 = vmatpush.bf16.msra.mxu2 %v3129_v36  ;;  %v3686_v31 = vld [vmem:[#allocation2 + $0x5f0] sm:$0xf0]  ;;  %v4184_v32 = vld [vmem:[#allocation2 + $0x2c4] sm:$0xf]  ;;  %v3065_v38 = vor.u32 %v4128_v26, %v3062_v27 }
  0x45   :  { %1386 = vmatpush.bf16.msrb.mxu3 %v2985_v41  ;;  %v3286_v35 = vld [vmem:[#allocation2 + $0x2d0] sm:$0xf0]  ;;  %v4216_v36 = vld [vmem:[#allocation2 + $0x3c4] sm:$0xf]  ;;  %v3689_v42 = vor.u32 %v4284_v30, %v3686_v31 }
  0x46   :  { %1348 = vmatpush.bf16.msrb.mxu0 %v3477_v50  ;;  %v3414_v37 = vld [vmem:[#allocation2 + $0x3d0] sm:$0xf0]  ;;  %v4248_v40 = vld [vmem:[#allocation2 + $0x4c4] sm:$0xf]  ;;  %v3289_v43 = vor.u32 %v4184_v32, %v3286_v35 }
  0x47   :  { %1361 = vmatpush.bf16.msrb.mxu1 %v3605_v54  ;;  %v3542_v41 = vld [vmem:[#allocation2 + $0x4d0] sm:$0xf0]  ;;  %v3417_v44 = vor.u32 %v4216_v36, %v3414_v37  ;;  %v4280_v45 = vld [vmem:[#allocation2 + $0x5c4] sm:$0xf] }
  0x48   :  { %1399 = vmatpush.bf16.msra.mxu2 %v3113_v49  ;;  %v3670_v46 = vld [vmem:[#allocation2 + $0x5d0] sm:$0xf0]  ;;  %v4180_v47 = vld [vmem:[#allocation2 + $0x2a4] sm:$0xf]  ;;  %v3545_v49 = vor.u32 %v4248_v40, %v3542_v41 }
  0x49   :  { %1387 = vmatpush.bf16.msrb.mxu3 %v2969_v55  ;;  %v3270_v50 = vld [vmem:[#allocation2 + $0x2b0] sm:$0xf0]  ;;  %v4212_v51 = vld [vmem:[#allocation2 + $0x3a4] sm:$0xf]  ;;  %v3673_v56 = vor.u32 %v4280_v45, %v3670_v46 }
  0x4a   :  { %1349 = vmatpush.bf16.msrb.mxu0 %v3461_v2  ;;  %v3398_v52 = vld [vmem:[#allocation2 + $0x3b0] sm:$0xf0]  ;;  %v4244_v54 = vld [vmem:[#allocation2 + $0x4a4] sm:$0xf]  ;;  %v3273_v57 = vor.u32 %v4180_v47, %v3270_v50 }
  0x4b   :  { %1362 = vmatpush.bf16.msrb.mxu1 %v3589_v6  ;;  %v3526_v55 = vld [vmem:[#allocation2 + $0x4b0] sm:$0xf0]  ;;  %v3401_v58 = vor.u32 %v4212_v51, %v3398_v52  ;;  %v4276_v61 = vld [vmem:[#allocation2 + $0x5a4] sm:$0xf] }
  0x4c   :  { %1400 = vmatpush.bf16.msra.mxu2 %v3097_v1  ;;  %v3654_v62 = vld [vmem:[#allocation2 + $0x5b0] sm:$0xf0]  ;;  %v4176_v63 = vld [vmem:[#allocation2 + $0x284] sm:$0xf]  ;;  %v3529_v0 = vor.u32 %v4244_v54, %v3526_v55 }
  0x4d   :  { %1388 = vmatpush.bf16.msrb.mxu3 %v2953_v7  ;;  %v3254_v1 = vld [vmem:[#allocation2 + $0x290] sm:$0xf0]  ;;  %v4208_v2 = vld [vmem:[#allocation2 + $0x384] sm:$0xf]  ;;  %v3657_v6 = vor.u32 %v4276_v61, %v3654_v62  ;;  %v3052_v61 = vld [vmem:[#allocation2 + $0xe8] sm:$0xf] }
  0x4e   :  { %1350 = vmatpush.bf16.msrb.mxu0 %v3445_v20  ;;  %v3382_v3 = vld [vmem:[#allocation2 + $0x390] sm:$0xf0]  ;;  %v4240_v4 = vld [vmem:[#allocation2 + $0x484] sm:$0xf]  ;;  %v3257_v7 = vor.u32 %v4176_v63, %v3254_v1  ;;  %v4127_v62 = vld [vmem:[#allocation2 + $0xf4] sm:$0xf0] }
  0x4f   :  { %1363 = vmatpush.bf16.msrb.mxu1 %v3573_v24  ;;  %v3510_v5 = vld [vmem:[#allocation2 + $0x490] sm:$0xf0]  ;;  %v3385_v8 = vor.u32 %v4208_v2, %v3382_v3  ;;  %v4272_v10 = vld [vmem:[#allocation2 + $0x584] sm:$0xf]  ;;  %v3180_v63 = vld [vmem:[#allocation2 + $0x1e8] sm:$0xf] }
  0x50   :  { %1401 = vmatpush.bf16.msra.mxu2 %v3081_v19  ;;  %v3638_v11 = vld [vmem:[#allocation2 + $0x590] sm:$0xf0]  ;;  %v4172_v12 = vld [vmem:[#allocation2 + $0x264] sm:$0xf]  ;;  %v3513_v13 = vor.u32 %v4240_v4, %v3510_v5  ;;  %v4159_v1 = vld [vmem:[#allocation2 + $0x1f4] sm:$0xf0] }
  0x51   :  { %1389 = vmatpush.bf16.msrb.mxu3 %v2937_v25  ;;  %1351 = vmatmul.bf16.vlgmr.msrb.gmra.mxu0 %v4619_v34  ;;  %v3238_v14 = vld [vmem:[#allocation2 + $0x270] sm:$0xf0]  ;;  %v4204_v15 = vld [vmem:[#allocation2 + $0x364] sm:$0xf]  ;;  %v3641_v19 = vor.u32 %v4272_v10, %v3638_v11  ;;  %v3053_v11 = vor.u32 %v4127_v62, %v3052_v61  ;;  %v4111_v61 = vld [vmem:[#allocation2 + $0x74] sm:$0xf0] }
  0x52   :  { %1408 = vmatpush.bf16.msra.mxu0 %v3305_v28  ;;  %1364 = vmatmul.bf16.vlgmr.msrb.gmra.mxu1 %v4621_v39  ;;  %v3366_v16 = vld [vmem:[#allocation2 + $0x370] sm:$0xf0]  ;;  %v4236_v17 = vld [vmem:[#allocation2 + $0x464] sm:$0xf]  ;;  %v3241_v20 = vor.u32 %v4172_v12, %v3238_v14  ;;  %v4191_v12 = vld [vmem:[#allocation2 + $0x2f4] sm:$0xf0] }
  0x53   :  { %1421 = vmatpush.bf16.msra.mxu1 %v3433_v29  ;;  %v3494_v18 = vld [vmem:[#allocation2 + $0x470] sm:$0xf0]  ;;  %v3369_v21 = vor.u32 %v4204_v15, %v3366_v16  ;;  %v4268_v22 = vld [vmem:[#allocation2 + $0x564] sm:$0xf]  ;;  %v4223_v14 = vld [vmem:[#allocation2 + $0x3f4] sm:$0xf0]  ;;  %v3181_v15 = vor.u32 %v4159_v1, %v3180_v63 }
  0x54   :  { %1402 = vmatpush.bf16.msra.mxu2 %v3065_v38  ;;  %1390 = vmatmul.bf16.vlgmr.msrb.gmra.mxu3 %v4601_v60  ;;  %v3622_v23 = vld [vmem:[#allocation2 + $0x570] sm:$0xf0]  ;;  %v4168_v24 = vld [vmem:[#allocation2 + $0x244] sm:$0xf]  ;;  %v3497_v25 = vor.u32 %v4236_v17, %v3494_v18  ;;  %v3036_v17 = vld [vmem:[#allocation2 + $0xc8] sm:$0xf] }
  0x55   :  { %1434 = vmatpush.bf16.msra.mxu3 %v3561_v33  ;;  %v3222_v26 = vld [vmem:[#allocation2 + $0x250] sm:$0xf0]  ;;  %v4200_v27 = vld [vmem:[#allocation2 + $0x344] sm:$0xf]  ;;  %v3625_v31 = vor.u32 %v4268_v22, %v3622_v23  ;;  %v4123_v18 = vld [vmem:[#allocation2 + $0xd4] sm:$0xf0] }
  0x56   :  { %1409 = vmatpush.bf16.msra.mxu0 %v3289_v43  ;;  %v3350_v28 = vld [vmem:[#allocation2 + $0x350] sm:$0xf0]  ;;  %v4232_v29 = vld [vmem:[#allocation2 + $0x444] sm:$0xf]  ;;  %v3225_v32 = vor.u32 %v4168_v24, %v3222_v26  ;;  %v3292_v24 = vld [vmem:[#allocation2 + $0x2c8] sm:$0xf] }
  0x57   :  { %1422 = vmatpush.bf16.msra.mxu1 %v3417_v44  ;;  %1403 = vmatmul.bf16.vlgmr.msra.gmra.mxu2 %v4605_v9  ;;  %v3478_v30 = vld [vmem:[#allocation2 + $0x450] sm:$0xf0]  ;;  %v3353_v33 = vor.u32 %v4200_v27, %v3350_v28  ;;  %v4264_v35 = vld [vmem:[#allocation2 + $0x544] sm:$0xf]  ;;  %v4187_v26 = vld [vmem:[#allocation2 + $0x2d4] sm:$0xf0] }
  0x58   :  { %1447 = vmatpush.bf16.msrb.mxu2 %v3689_v42  ;;  %v3606_v36 = vld [vmem:[#allocation2 + $0x550] sm:$0xf0]  ;;  %v4164_v37 = vld [vmem:[#allocation2 + $0x224] sm:$0xf]  ;;  %v3481_v38 = vor.u32 %v4232_v29, %v3478_v30  ;;  %v3420_v27 = vld [vmem:[#allocation2 + $0x3c8] sm:$0xf] }
  0x59   :  { %1435 = vmatpush.bf16.msra.mxu3 %v3545_v49  ;;  %v3206_v40 = vld [vmem:[#allocation2 + $0x230] sm:$0xf0]  ;;  %v4196_v41 = vld [vmem:[#allocation2 + $0x324] sm:$0xf]  ;;  %v3609_v45 = vor.u32 %v4264_v35, %v3606_v36  ;;  %v4219_v28 = vld [vmem:[#allocation2 + $0x3d4] sm:$0xf0]  ;;  %v3293_v35 = vor.u32 %v4187_v26, %v3292_v24 }
  0x5a   :  { %1410 = vmatpush.bf16.msra.mxu0 %v3273_v57  ;;  %v3334_v42 = vld [vmem:[#allocation2 + $0x330] sm:$0xf0]  ;;  %v4228_v43 = vld [vmem:[#allocation2 + $0x424] sm:$0xf]  ;;  %v3209_v49 = vor.u32 %v4164_v37, %v3206_v40  ;;  %v3020_v30 = vld [vmem:[#allocation2 + $0xa8] sm:$0xf]  ;;  %v3421_v36 = vor.u32 %v4219_v28, %v3420_v27 }
  0x5b   :  { %1423 = vmatpush.bf16.msra.mxu1 %v3401_v58  ;;  %v3462_v44 = vld [vmem:[#allocation2 + $0x430] sm:$0xf0]  ;;  %v4260_v46 = vld [vmem:[#allocation2 + $0x524] sm:$0xf]  ;;  %v3337_v50 = vor.u32 %v4196_v41, %v3334_v42  ;;  %v3276_v37 = vld [vmem:[#allocation2 + $0x2a8] sm:$0xf] }
  0x5c   :  { %1448 = vmatpush.bf16.msrb.mxu2 %v3673_v56  ;;  %v3590_v47 = vld [vmem:[#allocation2 + $0x530] sm:$0xf0]  ;;  %v4160_v51 = vld [vmem:[#allocation2 + $0x204] sm:$0xf]  ;;  %v3465_v55 = vor.u32 %v4228_v43, %v3462_v44  ;;  %v4183_v40 = vld [vmem:[#allocation2 + $0x2b4] sm:$0xf0] }
  0x5d   :  { %1436 = vmatpush.bf16.msra.mxu3 %v3529_v0  ;;  %v3190_v52 = vld [vmem:[#allocation2 + $0x210] sm:$0xf0]  ;;  %v4192_v54 = vld [vmem:[#allocation2 + $0x304] sm:$0xf]  ;;  %v3593_v0 = vor.u32 %v4260_v46, %v3590_v47  ;;  %v3404_v41 = vld [vmem:[#allocation2 + $0x3a8] sm:$0xf] }
  0x5e   :  { %1411 = vmatpush.bf16.msra.mxu0 %v3257_v7  ;;  %v3318_v56 = vld [vmem:[#allocation2 + $0x310] sm:$0xf0]  ;;  %v4224_v57 = vld [vmem:[#allocation2 + $0x404] sm:$0xf]  ;;  %v3193_v4 = vor.u32 %v4160_v51, %v3190_v52  ;;  %v4215_v42 = vld [vmem:[#allocation2 + $0x3b4] sm:$0xf0] }
  0x5f   :  { %1424 = vmatpush.bf16.msra.mxu1 %v3385_v8  ;;  %v3446_v58 = vld [vmem:[#allocation2 + $0x410] sm:$0xf0]  ;;  %v4288_v2 = vld [vmem:[#allocation2 + $0x604] sm:$0xf]  ;;  %v3321_v5 = vor.u32 %v4192_v54, %v3318_v56  ;;  %v3308_v8 = vld [vmem:[#allocation2 + $0x2e8] sm:$0xf] }
  0x60   :  { %1449 = vmatpush.bf16.msrb.mxu2 %v3657_v6  ;;  %v3702_v3 = vld [vmem:[#allocation2 + $0x610] sm:$0xf0]  ;;  %v4256_v6 = vld [vmem:[#allocation2 + $0x504] sm:$0xf]  ;;  %v3449_v10 = vor.u32 %v4224_v57, %v3446_v58  ;;  %v3309_v22 = vor.u32 %v4191_v12, %v3308_v8  ;;  %v3004_v44 = vld [vmem:[#allocation2 + $0x88] sm:$0xf] }
  0x61   :  { %1437 = vmatpush.bf16.msra.mxu3 %v3513_v13  ;;  %v3574_v7 = vld [vmem:[#allocation2 + $0x510] sm:$0xf0]  ;;  %v3436_v13 = vld [vmem:[#allocation2 + $0x3e8] sm:$0xf]  ;;  %v3705_v16 = vor.u32 %v4288_v2, %v3702_v3  ;;  %v4147_v47 = vld [vmem:[#allocation2 + $0x194] sm:$0xf0] }
  0x62   :  { %1412 = vmatpush.bf16.msra.mxu0 %v3241_v20  ;;  %v3164_v20 = vld [vmem:[#allocation2 + $0x1c8] sm:$0xf]  ;;  %v3437_v23 = vor.u32 %v4223_v14, %v3436_v13  ;;  %v4179_v54 = vld [vmem:[#allocation2 + $0x294] sm:$0xf0] }
  0x63   :  { %1425 = vmatpush.bf16.msra.mxu1 %v3369_v21  ;;  %v4155_v21 = vld [vmem:[#allocation2 + $0x1d4] sm:$0xf0]  ;;  %v3132_v46 = vld [vmem:[#allocation2 + $0x188] sm:$0xf] }
  0x64   :  { %1450 = vmatpush.bf16.msrb.mxu2 %v3641_v19  ;;  %v3577_v19 = vor.u32 %v4256_v6, %v3574_v7  ;;  %v3165_v29 = vor.u32 %v4155_v21, %v3164_v20  ;;  %v3260_v51 = vld [vmem:[#allocation2 + $0x288] sm:$0xf]  ;;  %v4211_v56 = vld [vmem:[#allocation2 + $0x394] sm:$0xf0]  ;;  %v3133_v57 = vor.u32 %v4147_v47, %v3132_v46 }
  0x65   :  { %1438 = vmatpush.bf16.msra.mxu3 %v3497_v25  ;;  %v3037_v25 = vor.u32 %v4123_v18, %v3036_v17  ;;  %v2988_v58 = vld [vmem:[#allocation2 + $0x68] sm:$0xf]  ;;  %v4143_v63 = vld [vmem:[#allocation2 + $0x174] sm:$0xf0] }
  0x66   :  { %1413 = vmatpush.bf16.msra.mxu0 %v3225_v32  ;;  %v3148_v32 = vld [vmem:[#allocation2 + $0x1a8] sm:$0xf]  ;;  %v2989_v3 = vor.u32 %v4111_v61, %v2988_v58  ;;  %v4207_v6 = vld [vmem:[#allocation2 + $0x374] sm:$0xf0] }
  0x67   :  { %1426 = vmatpush.bf16.msra.mxu1 %v3353_v33  ;;  %v4151_v33 = vld [vmem:[#allocation2 + $0x1b4] sm:$0xf0]  ;;  %v3116_v62 = vld [vmem:[#allocation2 + $0x168] sm:$0xf] }
  0x68   :  { %1451 = vmatpush.bf16.msrb.mxu2 %v3625_v31  ;;  %v4119_v31 = vld [vmem:[#allocation2 + $0xb4] sm:$0xf0]  ;;  %v3149_v43 = vor.u32 %v4151_v33, %v3148_v32  ;;  %v3244_v2 = vld [vmem:[#allocation2 + $0x268] sm:$0xf]  ;;  %v3117_v7 = vor.u32 %v4143_v63, %v3116_v62 }
  0x69   :  { %1439 = vmatpush.bf16.msra.mxu3 %v3481_v38  ;;  %v3021_v38 = vor.u32 %v4119_v31, %v3020_v30  ;;  %v2972_v8 = vld [vmem:[#allocation2 + $0x48] sm:$0xf]  ;;  %v4139_v12 = vld [vmem:[#allocation2 + $0x154] sm:$0xf0] }
  0x6a   :  { %1414 = vmatpush.bf16.msra.mxu0 %v3209_v49  ;;  %v3277_v49 = vor.u32 %v4183_v40, %v3276_v37  ;;  %v4171_v17 = vld [vmem:[#allocation2 + $0x254] sm:$0xf0]  ;;  %v3356_v18 = vld [vmem:[#allocation2 + $0x348] sm:$0xf] }
  0x6b   :  { %1427 = vmatpush.bf16.msra.mxu1 %v3337_v50  ;;  %v3405_v50 = vor.u32 %v4215_v42, %v3404_v41  ;;  %v2956_v21 = vld [vmem:[#allocation2 + $0x28] sm:$0xf]  ;;  %v4135_v24 = vld [vmem:[#allocation2 + $0x134] sm:$0xf0] }
  0x6c   :  { %1452 = vmatpush.bf16.msrb.mxu2 %v3609_v45  ;;  %v4115_v45 = vld [vmem:[#allocation2 + $0x94] sm:$0xf0]  ;;  %v3212_v27 = vld [vmem:[#allocation2 + $0x228] sm:$0xf] }
  0x6d   :  { %1440 = vmatpush.bf16.msra.mxu3 %v3465_v55  ;;  %v3005_v52 = vor.u32 %v4115_v45, %v3004_v44  ;;  %v3388_v55 = vld [vmem:[#allocation2 + $0x388] sm:$0xf]  ;;  %v4167_v28 = vld [vmem:[#allocation2 + $0x234] sm:$0xf0] }
  0x6e   :  { %1415 = vmatpush.bf16.msra.mxu0 %v3193_v4  ;;  %v3389_v1 = vor.u32 %v4211_v56, %v3388_v55  ;;  %v4175_v4 = vld [vmem:[#allocation2 + $0x274] sm:$0xf0]  ;;  %v3340_v30 = vld [vmem:[#allocation2 + $0x328] sm:$0xf]  ;;  %v3213_v42 = vor.u32 %v4167_v28, %v3212_v27  ;;  %v3054_v55 = vld [vmem:[#allocation2 + $0xf8] sm:$0xf0] }
  0x6f   :  { %1428 = vmatpush.bf16.msra.mxu1 %v3321_v5  ;;  %v3372_v5 = vld [vmem:[#allocation2 + $0x368] sm:$0xf]  ;;  %v3245_v13 = vor.u32 %v4175_v4, %v3244_v2  ;;  %v4199_v31 = vld [vmem:[#allocation2 + $0x334] sm:$0xf0] }
  0x70   :  { %1453 = vmatpush.bf16.msrb.mxu2 %v3593_v0  ;;  %v3261_v0 = vor.u32 %v4179_v54, %v3260_v51  ;;  %v3373_v14 = vor.u32 %v4207_v6, %v3372_v5  ;;  %v2940_v32 = vld [vmem:[#allocation2 + $0x8] sm:$0xf]  ;;  %v4131_v37 = vld [vmem:[#allocation2 + $0x114] sm:$0xf0]  ;;  %v4125_v51 = vld [vmem:[#allocation2 + $0xec] sm:$0xf] }
  0x71   :  { %1441 = vmatpush.bf16.msra.mxu3 %v3449_v10  ;;  %1416 = vmatmul.bf16.vlgmr.msra.gmra.mxu0 %v4597_v53  ;;  %v4107_v10 = vld [vmem:[#allocation2 + $0x54] sm:$0xf0]  ;;  %v3692_v41 = vld [vmem:[#allocation2 + $0x5e8] sm:$0xf]  ;;  %v4157_v5 = vld [vmem:[#allocation2 + $0x1ec] sm:$0xf] }
  0x72   :  { %1467 = vmatpush.bf16.msrb.mxu0 %v3705_v16  ;;  %1429 = vmatmul.bf16.vlgmr.msra.gmra.mxu1 %v4599_v59  ;;  %v2973_v16 = vor.u32 %v4107_v10, %v2972_v8  ;;  %v4255_v40 = vld [vmem:[#allocation2 + $0x4f4] sm:$0xf0]  ;;  %v3196_v45 = vld [vmem:[#allocation2 + $0x208] sm:$0xf]  ;;  %v3182_v6 = vld [vmem:[#allocation2 + $0x1f8] sm:$0xf0] }
  0x73   :  { %1473 = vmatpush.bf16.msrb.mxu1 %v3053_v11  ;;  %v3100_v11 = vld [vmem:[#allocation2 + $0x148] sm:$0xf]  ;;  %v4287_v44 = vld [vmem:[#allocation2 + $0x5f4] sm:$0xf0]  ;;  %v4121_v8 = vld [vmem:[#allocation2 + $0xcc] sm:$0xf] }
  0x74   :  { %1454 = vmatpush.bf16.msrb.mxu2 %v3577_v19  ;;  %1442 = vmatmul.bf16.vlgmr.msra.gmra.mxu3 %v4619_v34  ;;  %v4203_v19 = vld [vmem:[#allocation2 + $0x354] sm:$0xf0]  ;;  %v3101_v20 = vor.u32 %v4139_v12, %v3100_v11  ;;  %v3708_v56 = vld [vmem:[#allocation2 + $0x608] sm:$0xf]  ;;  %v3693_v58 = vor.u32 %v4287_v44, %v3692_v41  ;;  %v3038_v10 = vld [vmem:[#allocation2 + $0xd8] sm:$0xf0] }
  0x75   :  { %1486 = vmatpush.bf16.msrb.mxu3 %v3181_v15  ;;  %v3228_v15 = vld [vmem:[#allocation2 + $0x248] sm:$0xf]  ;;  %v3357_v26 = vor.u32 %v4203_v19, %v3356_v18  ;;  %v4163_v46 = vld [vmem:[#allocation2 + $0x214] sm:$0xf0]  ;;  %v4153_v18 = vld [vmem:[#allocation2 + $0x1cc] sm:$0xf] }
  0x76   :  { %1499 = vmatpush.bf16.msra.mxu0 %v3309_v22  ;;  %v4103_v22 = vld [vmem:[#allocation2 + $0x34] sm:$0xf0]  ;;  %v3548_v61 = vld [vmem:[#allocation2 + $0x4c8] sm:$0xf]  ;;  %v3197_v63 = vor.u32 %v4163_v46, %v3196_v45  ;;  %v3166_v19 = vld [vmem:[#allocation2 + $0x1d8] sm:$0xf0] }
  0x77   :  { %1474 = vmatpush.bf16.msrb.mxu1 %v3037_v25  ;;  %1455 = vmatmul.bf16.vlgmr.msrb.gmra.mxu2 %v4621_v39  ;;  %v3229_v25 = vor.u32 %v4171_v17, %v3228_v15  ;;  %v4251_v62 = vld [vmem:[#allocation2 + $0x4d4] sm:$0xf0]  ;;  %v3532_v12 = vld [vmem:[#allocation2 + $0x4a8] sm:$0xf]  ;;  %v3041_v17 = vor.u32 %v4121_v8, %v3038_v10  ;;  %v4145_v44 = vld [vmem:[#allocation2 + $0x18c] sm:$0xf] }
  0x78   :  { %1512 = vmatpush.bf16.msra.mxu2 %v3437_v23  ;;  %v3084_v23 = vld [vmem:[#allocation2 + $0x128] sm:$0xf]  ;;  %v4283_v2 = vld [vmem:[#allocation2 + $0x5d4] sm:$0xf0]  ;;  %v3134_v45 = vld [vmem:[#allocation2 + $0x198] sm:$0xf0] }
  0x79   :  { %1487 = vmatpush.bf16.msrb.mxu3 %v3165_v29  ;;  %v2957_v29 = vor.u32 %v4103_v22, %v2956_v21  ;;  %v3085_v33 = vor.u32 %v4135_v24, %v3084_v23  ;;  %v3660_v15 = vld [vmem:[#allocation2 + $0x5a8] sm:$0xf]  ;;  %v4117_v21 = vld [vmem:[#allocation2 + $0xac] sm:$0xf]  ;;  %v3022_v22 = vld [vmem:[#allocation2 + $0xb8] sm:$0xf0] }
  0x7a   :  { %1500 = vmatpush.bf16.msra.mxu0 %v3293_v35  ;;  %v4099_v35 = vld [vmem:[#allocation2 + $0x14] sm:$0xf0]  ;;  %v3516_v24 = vld [vmem:[#allocation2 + $0x488] sm:$0xf]  ;;  %v4137_v8 = vld [vmem:[#allocation2 + $0x14c] sm:$0xf] }
  0x7b   :  { %1475 = vmatpush.bf16.msrb.mxu1 %v3021_v38  ;;  %v3564_v38 = vld [vmem:[#allocation2 + $0x4e8] sm:$0xf]  ;;  %v2941_v47 = vor.u32 %v4099_v35, %v2940_v32  ;;  %v4275_v28 = vld [vmem:[#allocation2 + $0x594] sm:$0xf0]  ;;  %v3006_v35 = vld [vmem:[#allocation2 + $0x98] sm:$0xf0] }
  0x7c   :  { %1513 = vmatpush.bf16.msra.mxu2 %v3421_v36  ;;  %v3068_v36 = vld [vmem:[#allocation2 + $0x108] sm:$0xf]  ;;  %v3565_v54 = vor.u32 %v4255_v40, %v3564_v38  ;;  %v4239_v38 = vld [vmem:[#allocation2 + $0x474] sm:$0xf0]  ;;  %v3102_v10 = vld [vmem:[#allocation2 + $0x158] sm:$0xf0] }
  0x7d   :  { %1488 = vmatpush.bf16.msrb.mxu3 %v3149_v43  ;;  %v3341_v43 = vor.u32 %v4199_v31, %v3340_v30  ;;  %v3644_v27 = vld [vmem:[#allocation2 + $0x588] sm:$0xf]  ;;  %v4149_v30 = vld [vmem:[#allocation2 + $0x1ac] sm:$0xf]  ;;  %v3150_v31 = vld [vmem:[#allocation2 + $0x1b8] sm:$0xf0] }
  0x7e   :  { %1501 = vmatpush.bf16.msra.mxu0 %v3277_v49  ;;  %v3324_v49 = vld [vmem:[#allocation2 + $0x308] sm:$0xf]  ;;  %v3153_v40 = vor.u32 %v4149_v30, %v3150_v31 }
  0x7f   :  { %1476 = vmatpush.bf16.msrb.mxu1 %v3005_v52  ;;  %v3069_v52 = vor.u32 %v4131_v37, %v3068_v36  ;;  %v3645_v36 = vor.u32 %v4275_v28, %v3644_v27  ;;  %v3500_v37 = vld [vmem:[#allocation2 + $0x468] sm:$0xf]  ;;  %v4097_v28 = vld [vmem:[#allocation2 + $0xc] sm:$0xf] }
  0x80   :  { %1514 = vmatpush.bf16.msra.mxu2 %v3405_v50  ;;  %v4195_v50 = vld [vmem:[#allocation2 + $0x314] sm:$0xf0]  ;;  %v3628_v41 = vld [vmem:[#allocation2 + $0x568] sm:$0xf]  ;;  %v3501_v46 = vor.u32 %v4239_v38, %v3500_v37  ;;  %v4185_v37 = vld [vmem:[#allocation2 + $0x2cc] sm:$0xf] }
  0x81   :  { %1489 = vmatpush.bf16.msrb.mxu3 %v3133_v57  ;;  %3715 = vmatmul.msk.bf16.vlgmr.msrb.gmra.mxu0 %vm1287_vm0, %v4612_v48  ;;  %v4291_v57 = vld [vmem:[#allocation2 + $0x614] sm:$0xf0]  ;;  %v3294_v38 = vld [vmem:[#allocation2 + $0x2d8] sm:$0xf0] }
  0x82   :  { %1502 = vmatpush.bf16.msra.mxu0 %v3261_v0  ;;  %v3325_v0 = vor.u32 %v4195_v50, %v3324_v49  ;;  %v3709_v4 = vor.u32 %v4291_v57, %v3708_v56  ;;  %v2990_v49 = vld [vmem:[#allocation2 + $0x78] sm:$0xf0]  ;;  %v4267_v56 = vld [vmem:[#allocation2 + $0x554] sm:$0xf0] }
  0x83   :  { %1477 = vmatpush.bf16.msrb.mxu1 %v2989_v3  ;;  %v3057_v3 = vor.u32 %v4125_v51, %v3054_v55  ;;  %v3484_v51 = vld [vmem:[#allocation2 + $0x448] sm:$0xf] }
  0x84   :  { %1515 = vmatpush.bf16.msra.mxu2 %v3389_v1  ;;  %v3676_v1 = vld [vmem:[#allocation2 + $0x5c8] sm:$0xf] }
  0x85   :  { %1490 = vmatpush.bf16.msrb.mxu3 %v3117_v7  ;;  %v3549_v7 = vor.u32 %v4251_v62, %v3548_v61  ;;  %v3677_v11 = vor.u32 %v4283_v2, %v3676_v1  ;;  %v3612_v55 = vld [vmem:[#allocation2 + $0x548] sm:$0xf]  ;;  %v3118_v61 = vld [vmem:[#allocation2 + $0x178] sm:$0xf0] }
  0x86   :  { %1503 = vmatpush.bf16.msra.mxu0 %v3245_v13  ;;  %v4247_v13 = vld [vmem:[#allocation2 + $0x4b4] sm:$0xf0]  ;;  %v3613_v1 = vor.u32 %v4267_v56, %v3612_v55  ;;  %v3468_v2 = vld [vmem:[#allocation2 + $0x428] sm:$0xf]  ;;  %v4181_v55 = vld [vmem:[#allocation2 + $0x2ac] sm:$0xf] }
  0x87   :  { %1478 = vmatpush.bf16.msrb.mxu1 %v2973_v16  ;;  %v4279_v16 = vld [vmem:[#allocation2 + $0x5b4] sm:$0xf0]  ;;  %v3278_v56 = vld [vmem:[#allocation2 + $0x2b8] sm:$0xf0] }
  0x88   :  { %1516 = vmatpush.bf16.msra.mxu2 %v3373_v14  ;;  %v3185_v14 = vor.u32 %v4157_v5, %v3182_v6  ;;  %v3661_v23 = vor.u32 %v4279_v16, %v3660_v15  ;;  %v3596_v5 = vld [vmem:[#allocation2 + $0x528] sm:$0xf]  ;;  %v4263_v6 = vld [vmem:[#allocation2 + $0x534] sm:$0xf0] }
  0x89   :  { %1491 = vmatpush.bf16.msrb.mxu3 %v3101_v20  ;;  %v3533_v20 = vor.u32 %v4247_v13, %v3532_v12  ;;  %v4101_v12 = vld [vmem:[#allocation2 + $0x2c] sm:$0xf]  ;;  %v2958_v13 = vld [vmem:[#allocation2 + $0x38] sm:$0xf0]  ;;  %v3597_v15 = vor.u32 %v4263_v6, %v3596_v5  ;;  %v4227_v16 = vld [vmem:[#allocation2 + $0x414] sm:$0xf0] }
  0x8a   :  { %1504 = vmatpush.bf16.msra.mxu0 %v3229_v25  ;;  %v4243_v25 = vld [vmem:[#allocation2 + $0x494] sm:$0xf0]  ;;  %v4177_v5 = vld [vmem:[#allocation2 + $0x28c] sm:$0xf]  ;;  %v3262_v6 = vld [vmem:[#allocation2 + $0x298] sm:$0xf0] }
  0x8b   :  { %1479 = vmatpush.bf16.msrb.mxu1 %v2957_v29  ;;  %v3025_v29 = vor.u32 %v4117_v21, %v3022_v22  ;;  %v3517_v32 = vor.u32 %v4243_v25, %v3516_v24  ;;  %v3310_v21 = vld [vmem:[#allocation2 + $0x2f8] sm:$0xf0]  ;;  %v4221_v22 = vld [vmem:[#allocation2 + $0x3ec] sm:$0xf] }
  0x8c   :  { %1517 = vmatpush.bf16.msra.mxu2 %v3357_v26  ;;  %v3169_v26 = vor.u32 %v4153_v18, %v3166_v19  ;;  %v4259_v18 = vld [vmem:[#allocation2 + $0x514] sm:$0xf0]  ;;  %v3105_v19 = vor.u32 %v4137_v8, %v3102_v10  ;;  %v3438_v24 = vld [vmem:[#allocation2 + $0x3f8] sm:$0xf0]  ;;  %v4133_v25 = vld [vmem:[#allocation2 + $0x12c] sm:$0xf] }
  0x8d   :  { %1492 = vmatpush.bf16.msrb.mxu3 %v3085_v33  ;;  %v4113_v33 = vld [vmem:[#allocation2 + $0x8c] sm:$0xf]  ;;  %v3390_v10 = vld [vmem:[#allocation2 + $0x398] sm:$0xf0] }
  0x8e   :  { %1505 = vmatpush.bf16.msra.mxu0 %v3213_v42  ;;  %v4271_v42 = vld [vmem:[#allocation2 + $0x574] sm:$0xf0]  ;;  %v4209_v8 = vld [vmem:[#allocation2 + $0x38c] sm:$0xf] }
  0x8f   :  { %1480 = vmatpush.bf16.msrb.mxu1 %v2941_v47  ;;  %v4109_v47 = vld [vmem:[#allocation2 + $0x6c] sm:$0xf]  ;;  %v3629_v50 = vor.u32 %v4271_v42, %v3628_v41  ;;  %v3422_v42 = vld [vmem:[#allocation2 + $0x3d8] sm:$0xf0] }
  0x90   :  { %1518 = vmatpush.bf16.msra.mxu2 %v3341_v43  ;;  %v3009_v43 = vor.u32 %v4113_v33, %v3006_v35  ;;  %v2993_v57 = vor.u32 %v4109_v47, %v2990_v49  ;;  %v3566_v33 = vld [vmem:[#allocation2 + $0x4f8] sm:$0xf0]  ;;  %v3441_v35 = vor.u32 %v4221_v22, %v3438_v24  ;;  %v3297_v49 = vor.u32 %v4185_v37, %v3294_v38  ;;  %v4273_v24 = vld [vmem:[#allocation2 + $0x58c] sm:$0xf] }
  0x91   :  { %1493 = vmatpush.bf16.msrb.mxu3 %v3069_v52  ;;  %v4235_v52 = vld [vmem:[#allocation2 + $0x454] sm:$0xf0]  ;;  %v3694_v47 = vld [vmem:[#allocation2 + $0x5f8] sm:$0xf0]  ;;  %v4269_v38 = vld [vmem:[#allocation2 + $0x56c] sm:$0xf] }
  0x92   :  { %1506 = vmatpush.bf16.msra.mxu0 %v3197_v63  ;;  %1481 = vmatmul.bf16.vlgmr.msrb.gmra.mxu1 %v4601_v60  ;;  %v3485_v62 = vor.u32 %v4235_v52, %v3484_v51  ;;  %v4105_v63 = vld [vmem:[#allocation2 + $0x4c] sm:$0xf]  ;;  %v3550_v51 = vld [vmem:[#allocation2 + $0x4d8] sm:$0xf0] }
  0x93   :  { %1525 = vmatpush.bf16.msra.mxu1 %v3565_v54  ;;  %v3137_v54 = vor.u32 %v4145_v44, %v3134_v45  ;;  %v3070_v44 = vld [vmem:[#allocation2 + $0x118] sm:$0xf0] }
  0x94   :  { %1519 = vmatpush.bf16.msra.mxu2 %v3325_v0  ;;  %1494 = vmatmul.bf16.vlgmr.msrb.gmra.mxu3 %v4605_v9  ;;  %v2974_v0 = vld [vmem:[#allocation2 + $0x58] sm:$0xf0] }
  0x95   :  { %1538 = vmatpush.bf16.msra.mxu3 %v3693_v58  ;;  %1507 = vmatmul.bf16.vlgmr.msra.gmra.mxu0 %v4597_v53  ;;  %v4141_v58 = vld [vmem:[#allocation2 + $0x16c] sm:$0xf]  ;;  %v3374_v22 = vld [vmem:[#allocation2 + $0x378] sm:$0xf0] }
  0x96   :  { %1558 = vmatpush.bf16.msrb.mxu0 %v3709_v4  ;;  %v3121_v4 = vor.u32 %v4141_v58, %v3118_v61  ;;  %v4213_v58 = vld [vmem:[#allocation2 + $0x3ac] sm:$0xf]  ;;  %v3406_v61 = vld [vmem:[#allocation2 + $0x3b8] sm:$0xf0] }
  0x97   :  { %1526 = vmatpush.bf16.msra.mxu1 %v3549_v7  ;;  %1520 = vmatmul.bf16.vlgmr.msra.gmra.mxu2 %v4599_v59  ;;  %v2977_v7 = vor.u32 %v4105_v63, %v2974_v0  ;;  %v4281_v63 = vld [vmem:[#allocation2 + $0x5cc] sm:$0xf]  ;;  %v3678_v0 = vld [vmem:[#allocation2 + $0x5d8] sm:$0xf0] }
  0x98   :  { %1564 = vmatpush.bf16.msrb.mxu2 %v3057_v3  ;;  %v4231_v3 = vld [vmem:[#allocation2 + $0x434] sm:$0xf0] }
  0x99   :  { %1539 = vmatpush.bf16.msra.mxu3 %v3677_v11  ;;  %v3469_v11 = vor.u32 %v4231_v3, %v3468_v2  ;;  %v4245_v2 = vld [vmem:[#allocation2 + $0x4ac] sm:$0xf]  ;;  %v3534_v3 = vld [vmem:[#allocation2 + $0x4b8] sm:$0xf0] }
  0x9a   :  { %1577 = vmatpush.bf16.msra.mxu0 %v3185_v14  ;;  %v3452_v14 = vld [vmem:[#allocation2 + $0x408] sm:$0xf] }
  0x9b   :  { %1527 = vmatpush.bf16.msra.mxu1 %v3533_v20  ;;  %v4189_v20 = vld [vmem:[#allocation2 + $0x2ec] sm:$0xf]  ;;  %v3453_v27 = vor.u32 %v4227_v16, %v3452_v14  ;;  %v3265_v14 = vor.u32 %v4177_v5, %v3262_v6  ;;  %v3518_v16 = vld [vmem:[#allocation2 + $0x498] sm:$0xf0] }
  0x9c   :  { %1565 = vmatpush.bf16.msrb.mxu2 %v3041_v17  ;;  %v3580_v17 = vld [vmem:[#allocation2 + $0x508] sm:$0xf]  ;;  %v3313_v31 = vor.u32 %v4189_v20, %v3310_v21  ;;  %v4205_v21 = vld [vmem:[#allocation2 + $0x36c] sm:$0xf]  ;;  %v3326_v6 = vld [vmem:[#allocation2 + $0x318] sm:$0xf0] }
  0x9d   :  { %1540 = vmatpush.bf16.msra.mxu3 %v3661_v23  ;;  %v2961_v23 = vor.u32 %v4101_v12, %v2958_v13  ;;  %v3581_v30 = vor.u32 %v4259_v18, %v3580_v17  ;;  %v4277_v12 = vld [vmem:[#allocation2 + $0x5ac] sm:$0xf]  ;;  %v3662_v13 = vld [vmem:[#allocation2 + $0x5b8] sm:$0xf0]  ;;  %v3393_v17 = vor.u32 %v4209_v8, %v3390_v10 }
  0x9e   :  { %1578 = vmatpush.bf16.msra.mxu0 %v3169_v26  ;;  %v3086_v26 = vld [vmem:[#allocation2 + $0x138] sm:$0xf0]  ;;  %v4173_v18 = vld [vmem:[#allocation2 + $0x26c] sm:$0xf]  ;;  %v3665_v20 = vor.u32 %v4277_v12, %v3662_v13 }
  0x9f   :  { %1528 = vmatpush.bf16.msra.mxu1 %v3517_v32  ;;  %v4253_v32 = vld [vmem:[#allocation2 + $0x4ec] sm:$0xf]  ;;  %v3710_v8 = vld [vmem:[#allocation2 + $0x618] sm:$0xf0] }
  0xa0   :  { %1566 = vmatpush.bf16.msrb.mxu2 %v3025_v29  ;;  %v2942_v29 = vld [vmem:[#allocation2 + $0x18] sm:$0xf0]  ;;  %v3569_v45 = vor.u32 %v4253_v32, %v3566_v33  ;;  %v4201_v33 = vld [vmem:[#allocation2 + $0x34c] sm:$0xf] }
  0xa1   :  { %1541 = vmatpush.bf16.msra.mxu3 %v3645_v36  ;;  %v3089_v36 = vor.u32 %v4133_v25, %v3086_v26  ;;  %v2945_v41 = vor.u32 %v4097_v28, %v2942_v29  ;;  %v3646_v25 = vld [vmem:[#allocation2 + $0x598] sm:$0xf0]  ;;  %v3377_v29 = vor.u32 %v4205_v21, %v3374_v22  ;;  %v4261_v12 = vld [vmem:[#allocation2 + $0x52c] sm:$0xf] }
  0xa2   :  { %1579 = vmatpush.bf16.msra.mxu0 %v3153_v40  ;;  %v4217_v40 = vld [vmem:[#allocation2 + $0x3cc] sm:$0xf]  ;;  %v3502_v28 = vld [vmem:[#allocation2 + $0x478] sm:$0xf0] }
  0xa3   :  { %1529 = vmatpush.bf16.msra.mxu1 %v3501_v46  ;;  %v4285_v46 = vld [vmem:[#allocation2 + $0x5ec] sm:$0xf]  ;;  %v3425_v52 = vor.u32 %v4217_v40, %v3422_v42  ;;  %v3630_v40 = vld [vmem:[#allocation2 + $0x578] sm:$0xf0] }
  0xa4   :  { %1567 = vmatpush.bf16.msrb.mxu2 %v3009_v43  ;;  %v4129_v43 = vld [vmem:[#allocation2 + $0x10c] sm:$0xf]  ;;  %v3598_v13 = vld [vmem:[#allocation2 + $0x538] sm:$0xf0] }
  0xa5   :  { %1542 = vmatpush.bf16.msra.mxu3 %v3629_v50  ;;  %3716 = vmatmul.msk.bf16.vlgmr.msrb.gmra.mxu0 %vm1287_vm0, %v4612_v48  ;;  %v4249_v50 = vld [vmem:[#allocation2 + $0x4cc] sm:$0xf]  ;;  %v3601_v21 = vor.u32 %v4261_v12, %v3598_v13  ;;  %v3768_v13 = vld [vmem:[#allocation5 + $0x60] sm:$0xf] }
  0xa6   :  { %1580 = vmatpush.bf16.msra.mxu0 %v3137_v54  ;;  %v3073_v54 = vor.u32 %v4129_v43, %v3070_v44  ;;  %v4233_v43 = vld [vmem:[#allocation2 + $0x44c] sm:$0xf]  ;;  %v3486_v44 = vld [vmem:[#allocation2 + $0x458] sm:$0xf0] }
  0xa7   :  { %1530 = vmatpush.bf16.msra.mxu1 %v3485_v62  ;;  %v3553_v62 = vor.u32 %v4249_v50, %v3550_v51  ;;  %v3214_v50 = vld [vmem:[#allocation2 + $0x238] sm:$0xf0]  ;;  %v3633_v51 = vor.u32 %v4269_v38, %v3630_v40 }
  0xa8   :  { %1568 = vmatpush.bf16.msrb.mxu2 %v2993_v57  ;;  %v3697_v57 = vor.u32 %v4285_v46, %v3694_v47 }
  0xa9   :  { %1543 = vmatpush.bf16.msra.mxu3 %v3613_v1  ;;  %v3281_v1 = vor.u32 %v4181_v55, %v3278_v56 }
  0xaa   :  { %1581 = vmatpush.bf16.msra.mxu0 %v3121_v4  ;;  %v3409_v4 = vor.u32 %v4213_v58, %v3406_v61  ;;  %v4265_v58 = vld [vmem:[#allocation2 + $0x54c] sm:$0xf]  ;;  %v3614_v61 = vld [vmem:[#allocation2 + $0x558] sm:$0xf0] }
  0xab   :  { %1531 = vmatpush.bf16.msra.mxu1 %v3469_v11  ;;  %v3537_v11 = vor.u32 %v4245_v2, %v3534_v3  ;;  %v4161_v2 = vld [vmem:[#allocation2 + $0x20c] sm:$0xf]  ;;  %v3198_v3 = vld [vmem:[#allocation2 + $0x218] sm:$0xf0]  ;;  %v3617_v5 = vor.u32 %v4265_v58, %v3614_v61 }
  0xac   :  { %1569 = vmatpush.bf16.msrb.mxu2 %v2977_v7  ;;  %v3681_v7 = vor.u32 %v4281_v63, %v3678_v0  ;;  %v4229_v63 = vld [vmem:[#allocation2 + $0x42c] sm:$0xf]  ;;  %v3470_v0 = vld [vmem:[#allocation2 + $0x438] sm:$0xf0] }
  0xad   :  { %1544 = vmatpush.bf16.msra.mxu3 %v3597_v15  ;;  %v4241_v15 = vld [vmem:[#allocation2 + $0x48c] sm:$0xf] }
  0xae   :  { %1582 = vmatpush.bf16.msra.mxu0 %v3105_v19  ;;  %v3246_v19 = vld [vmem:[#allocation2 + $0x278] sm:$0xf0] }
  0xaf   :  { %1532 = vmatpush.bf16.msra.mxu1 %v3453_v27  ;;  %v3249_v26 = vor.u32 %v4173_v18, %v3246_v19  ;;  %v4237_v27 = vld [vmem:[#allocation2 + $0x46c] sm:$0xf] }
  0xb0   :  { %1570 = vmatpush.bf16.msrb.mxu2 %v2961_v23  ;;  %v3505_v37 = vor.u32 %v4237_v27, %v3502_v28 }
  0xb1   :  { %1545 = vmatpush.bf16.msra.mxu3 %v3581_v30  ;;  %v3230_v30 = vld [vmem:[#allocation2 + $0x258] sm:$0xf0] }
  0xb2   :  { %1583 = vmatpush.bf16.msra.mxu0 %v3089_v36  ;;  %1533 = vmatmul.bf16.vlgmr.msra.gmra.mxu1 %v4619_v34 }
  0xb3   :  { %1590 = vmatpush.bf16.msrb.mxu1 %v3313_v31  ;;  %v3649_v31 = vor.u32 %v4273_v24, %v3646_v25 }
  0xb4   :  { %1571 = vmatpush.bf16.msrb.mxu2 %v2945_v41  ;;  %1546 = vmatmul.bf16.vlgmr.msra.gmra.mxu3 %v4621_v39  ;;  %v1300_v23 = vpop.f32.mrf.mxu0 }
  0xb5   :  { %1603 = vmatpush.bf16.msrb.mxu3 %v3441_v35  ;;  %v1313_v32 = vpop.f32.mrf.mxu1  ;;  %v3358_v35 = vld [vmem:[#allocation2 + $0x358] sm:$0xf0] }
  0xb6   :  { %1584 = vmatpush.bf16.msra.mxu0 %v3073_v54  ;;  %v1314_v36 = vadd.f32 %v1313_v32, %v1300_v23  ;;  %v1326_v41 = vpop.f32.mrf.mxu2  ;;  %v3342_v54 = vld [vmem:[#allocation2 + $0x338] sm:$0xf0]  ;;  %v4257_v23 = vld [vmem:[#allocation2 + $0x50c] sm:$0xf] }
  0xb7   :  { %1591 = vmatpush.bf16.msrb.mxu1 %v3297_v49  ;;  %1572 = vmatmul.bf16.vlgmr.msrb.gmra.mxu2 %v4601_v60  ;;  %v3521_v60 = vor.u32 %v4241_v15, %v3518_v16  ;;  %v1339_v47 = vpop.f32.mrf.mxu3  ;;  %v4165_v49 = vld [vmem:[#allocation2 + $0x22c] sm:$0xf]  ;;  %v3201_v15 = vor.u32 %v4161_v2, %v3198_v3  ;;  %v3776_v2 = vld [vmem:[#allocation5 + $0x70] sm:$0xf]  ;;  %v4307_v3 = vld [vmem:[#allocation5 + $0x74] sm:$0xf0] }
  0xb8   :  { %1616 = vmatpush.bf16.msra.mxu2 %v3569_v45  ;;  %v3361_v45 = vor.u32 %v4201_v33, %v3358_v35  ;;  %v1327_v46 = vadd.f32 %v1326_v41, %v1314_v36  ;;  %v4225_v16 = vld [vmem:[#allocation2 + $0x40c] sm:$0xf] }
  0xb9   :  { %1604 = vmatpush.bf16.msrb.mxu3 %v3425_v52  ;;  %1585 = vmatmul.bf16.vlgmr.msra.gmra.mxu0 %v4605_v9  ;;  %v4169_v9 = vld [vmem:[#allocation2 + $0x24c] sm:$0xf] }
  0xba   :  { %1629 = vmatpush.bf16.msrb.mxu0 %v3697_v57  ;;  %v3233_v42 = vor.u32 %v4169_v9, %v3230_v30  ;;  %v4197_v52 = vld [vmem:[#allocation2 + $0x32c] sm:$0xf]  ;;  %v1340_v56 = vadd.f32 %v1339_v47, %v1327_v46  ;;  %v3489_v57 = vor.u32 %v4233_v43, %v3486_v44 }
  0xbb   :  { %1592 = vmatpush.bf16.msrb.mxu1 %v3281_v1  ;;  %v3345_v1 = vor.u32 %v4197_v52, %v3342_v54 }
  0xbc   :  { %1617 = vmatpush.bf16.msra.mxu2 %v3553_v62  ;;  %v1302_v55 = vpop.f32.mrf.mxu0  ;;  %v3217_v62 = vor.u32 %v4165_v49, %v3214_v50 }
  0xbd   :  { %1605 = vmatpush.bf16.msrb.mxu3 %v3409_v4  ;;  %v4193_v4 = vld [vmem:[#allocation2 + $0x30c] sm:$0xf]  ;;  %v1315_v10 = vpop.f32.mrf.mxu1 }
  0xbe   :  { %1630 = vmatpush.bf16.msrb.mxu0 %v3681_v7  ;;  %v4289_v7 = vld [vmem:[#allocation2 + $0x60c] sm:$0xf]  ;;  %v3329_v18 = vor.u32 %v4193_v4, %v3326_v6  ;;  %v3840_v4 = vld [vmem:[#allocation5 + $0xf0] sm:$0xf]  ;;  %v4323_v6 = vld [vmem:[#allocation5 + $0xf4] sm:$0xf0] }
  0xbf   :  { %1593 = vmatpush.bf16.msrb.mxu1 %v3265_v14  ;;  %v1328_v14 = vpop.f32.mrf.mxu2  ;;  %v3713_v19 = vor.u32 %v4289_v7, %v3710_v8  ;;  %v3841_v10 = vor.u32 %v4323_v6, %v3840_v4 }
  0xc0   :  { %1618 = vmatpush.bf16.msra.mxu2 %v3537_v11  ;;  %v3473_v11 = vor.u32 %v4229_v63, %v3470_v0  ;;  %v4305_v14 = vld [vmem:[#allocation5 + $0x64] sm:$0xf0] }
  0xc1   :  { %1606 = vmatpush.bf16.msrb.mxu3 %v3393_v17  ;;  %v3454_v17 = vld [vmem:[#allocation2 + $0x418] sm:$0xf0] }
  0xc2   :  { %1631 = vmatpush.bf16.msrb.mxu0 %v3665_v20  ;;  %v1341_v20 = vpop.f32.mrf.mxu3  ;;  %v3457_v22 = vor.u32 %v4225_v16, %v3454_v17  ;;  %v3769_v16 = vor.u32 %v4305_v14, %v3768_v13  ;;  %v4321_v17 = vld [vmem:[#allocation5 + $0xe4] sm:$0xf0]  ;;  %v4311_v14 = vld [vmem:[#allocation5 + $0x94] sm:$0xf0] }
  0xc3   :  { %1594 = vmatpush.bf16.msrb.mxu1 %v3249_v26 }
  0xc4   :  { %1619 = vmatpush.bf16.msra.mxu2 %v3521_v60  ;;  %v3582_v60 = vld [vmem:[#allocation2 + $0x518] sm:$0xf0] }
  0xc5   :  { %1607 = vmatpush.bf16.msrb.mxu3 %v3377_v29  ;;  %v3585_v24 = vor.u32 %v4257_v23, %v3582_v60 }
  0xc6   :  { %1632 = vmatpush.bf16.msrb.mxu0 %v3649_v31 }
  0xc7   :  { %1595 = vmatpush.bf16.msrb.mxu1 %v3233_v42  ;;  %v1378_v25 = vpop.f32.mrf.mxu2 }
  0xc8   :  { %1620 = vmatpush.bf16.msra.mxu2 %v3505_v37 }
  0xc9   :  { %1608 = vmatpush.bf16.msrb.mxu3 %v3361_v45 }
  0xca   :  { %1633 = vmatpush.bf16.msrb.mxu0 %v3633_v51 }
  0xcb   :  { %1596 = vmatpush.bf16.msrb.mxu1 %v3217_v62 }
  0xcc   :  { %1621 = vmatpush.bf16.msra.mxu2 %v3489_v57 }
  0xcd   :  { %1609 = vmatpush.bf16.msrb.mxu3 %v3345_v1 }
  0xce   :  { %1634 = vmatpush.bf16.msrb.mxu0 %v3617_v5  ;;  %v1352_v26 = vpop.f32.mrf.mxu0  ;;  %v3777_v5 = vor.u32 %v4307_v3, %v3776_v2 }
  0xcf   :  { %1597 = vmatpush.bf16.msrb.mxu1 %v3201_v15  ;;  %v1365_v27 = vpop.f32.mrf.mxu1  ;;  %v1380_v28 = vpop.f32.mrf.mxu2  ;;  %v1353_v29 = vadd.f32 %v1352_v26, %v1340_v56  ;;  %v3832_v15 = vld [vmem:[#allocation5 + $0xe0] sm:$0xf]  ;;  %v3824_v26 = vld [vmem:[#allocation5 + $0xd0] sm:$0xf] }
  0xd0   :  { %1622 = vmatpush.bf16.msra.mxu2 %v3473_v11  ;;  %v3833_v20 = vor.u32 %v4321_v17, %v3832_v15  ;;  %v4319_v28 = vld [vmem:[#allocation5 + $0xd4] sm:$0xf0] }
  0xd1   :  { %1610 = vmatpush.bf16.msrb.mxu3 %v3329_v18  ;;  %v1366_v31 = vadd.f32 %v1365_v27, %v1353_v29 }
  0xd2   :  { %1635 = vmatpush.bf16.msrb.mxu0 %v3601_v21  ;;  %1598 = vmatmul.bf16.vlgmr.msrb.gmra.mxu1 %v4597_v53 }
  0xd3   :  { %1649 = vmatpush.bf16.msra.mxu1 %v3713_v19  ;;  %v4649_v33 = vadd.f32 %v1378_v25, %v1366_v31  ;;  %v4303_v25 = vld [vmem:[#allocation5 + $0x54] sm:$0xf0]  ;;  %v3825_v31 = vor.u32 %v4319_v28, %v3824_v26 }
  0xd4   :  { %1623 = vmatpush.bf16.msra.mxu2 %v3457_v22  ;;  %1611 = vmatmul.bf16.vlgmr.msrb.gmra.mxu3 %v4599_v59  ;;  %v4535_v59 = vmov 8.0  }
  0xd5   :  { %4397 = vrcp.f32 %v4535_v59  ;;  %v1655_v35 = vrot.slane %v4649_v33, 4  ;;  %2241 = vmatpush.bf16.msra.mxu3 %v3777_v5  ;;  %v3752_v59 = vld [vmem:[#allocation5 + $0x40] sm:$0xf] }
  0xd6   :  { %1636 = vmatpush.bf16.msrb.mxu0 %v3585_v24  ;;  %v1354_v9 = vpop.f32.mrf.mxu0  ;;  %v3760_v24 = vld [vmem:[#allocation5 + $0x50] sm:$0xf] }
  0xd7   :  { %1624 = vmatmul.bf16.vlgmr.msra.gmra.mxu2 %v4619_v34  ;;  %v1391_v30 = vpop.f32.mrf.mxu3  ;;  %v1367_v53 = vpop.f32.mrf.mxu1  ;;  %v1656_v38 = vadd.f32 %v1655_v35, %v4649_v33  ;;  %2254 = vmatpush.bf16.msrb.mxu1 %v3841_v10  ;;  %v3761_v27 = vor.u32 %v4303_v25, %v3760_v24  ;;  %v4295_v10 = vld [vmem:[#allocation5 + $0x14] sm:$0xf0]  ;;  %v4309_v24 = vld [vmem:[#allocation5 + $0x84] sm:$0xf0]  ;;  %v4306_v25 = vld [vmem:[#allocation5 + $0x74] sm:$0xf] }
  0xd9   :  { %1637 = vmatmul.bf16.vlgmr.msrb.gmra.mxu0 %v4621_v39  ;;  %v1690_v39 = vmul.f32 %v4649_v33, %v4649_v33  ;;  %v1657_v41 = vrot.slane %v1656_v38, 2  ;;  %2242 = vmatpush.bf16.msra.mxu3 %v3769_v16 }
  0xda   :  { %v1404_v32 = vpop.f32.mrf.mxu2 }
  0xdb   :  { %v4398_v37 = vpop.eup %4397  ;;  %v1405_v44 = vadd.f32 %v1404_v32, %v1391_v30  ;;  %v1658_v45 = vadd.f32 %v1657_v41, %v1656_v38  ;;  %2255 = vmatpush.bf16.msrb.mxu1 %v3833_v20  ;;  %v3720_v20 = vld [vmem:[#allocation5] sm:$0xf] }
  0xdc   :  { %v1680_v40 = vmul.f32 8.0, %v4398_v37  ;;  %vm1684_vm1 = vweird.f32 %v4398_v37 }
  0xdd   :  { %v1659_v51 = vrot.slane %v1658_v45, 1  ;;  %2243 = vmatpush.bf16.msra.mxu3 %v3761_v27 }
  0xde   :  { %v1681_v43 = vsub.f32 1.0, %v1680_v40 }
  0xdf   :  { %v1393_v34 = vpop.f32.mrf.mxu3  ;;  %v1660_v57 = vadd.f32 %v1659_v51, %v1658_v45  ;;  %2256 = vmatpush.bf16.msrb.mxu1 %v3825_v31  ;;  %v4299_v45 = vld [vmem:[#allocation5 + $0x34] sm:$0xf0] }
  0xe0   :  { %v1682_v47 = vmul.f32 %v4398_v37, %v1681_v43  ;;  %v4301_v34 = vld [vmem:[#allocation5 + $0x44] sm:$0xf0] }
  0xe1   :  { %v3753_v35 = vor.u32 %v4301_v34, %v3752_v59 }
  0xe2   :  { %3717 = vmatmul.msk.bf16.vlgmr.msra.gmra.mxu1 %vm1287_vm0, %v4612_v48  ;;  %v1406_v36 = vpop.f32.mrf.mxu2  ;;  %v1694_v48 = vrot.slane %v1690_v39, 4  ;;  %v1683_v54 = vadd.f32 %v4398_v37, %v1682_v47  ;;  %v3808_v47 = vld [vmem:[#allocation5 + $0xb0] sm:$0xf] }
  0xe3   :  { %v4317_v36 = vld [vmem:[#allocation5 + $0xc4] sm:$0xf0]  ;;  %2244 = vmatpush.bf16.msra.mxu3 %v3753_v35  ;;  %v4304_v35 = vld [vmem:[#allocation5 + $0x64] sm:$0xf] }
  0xe4   :  { %v1695_v42 = vadd.f32 %v1694_v48, %v1690_v39  ;;  %v4655_v61 = vsel %vm1684_vm1, %v4398_v37, %v1683_v54  ;;  %v3816_v39 = vld [vmem:[#allocation5 + $0xc0] sm:$0xf] }
  0xe5   :  { %v4658_v7 = vmul.f32 %v4655_v61, %v1660_v57  ;;  %v3817_v40 = vor.u32 %v4317_v36, %v3816_v39  ;;  %v3736_v57 = vld [vmem:[#allocation5 + $0x20] sm:$0xf]  ;;  %v3770_v39 = vld [vmem:[#allocation5 + $0x68] sm:$0xf0]  ;;  %v4320_v36 = vld [vmem:[#allocation5 + $0xe4] sm:$0xf] }
  0xe6   :  { %v1696_v46 = vrot.slane %v1695_v42, 2 }
  0xe7   :  { %v1722_v19 = vmul.f32 %v4658_v7, %v4658_v7  ;;  %2257 = vmatpush.bf16.msrb.mxu1 %v3817_v40 }
  0xe8   :  { %v1697_v52 = vadd.f32 %v1696_v46, %v1695_v42 }
  0xea   :  { %v1698_v58 = vrot.slane %v1697_v52, 1 }
  0xec   :  { %v1699_v8 = vadd.f32 %v1698_v58, %v1697_v52  ;;  %v4297_v58 = vld [vmem:[#allocation5 + $0x24] sm:$0xf0] }
  0xee   :  { %v1417_v49 = vpop.f32.mrf.mxu0  ;;  %v1718_v18 = vmul.f32 %v1699_v8, %v4655_v61  ;;  %v3728_v8 = vld [vmem:[#allocation5 + $0x10] sm:$0xf] }
  0xef   :  { %v1418_v50 = vadd.f32 %v1417_v49, %v1405_v44  ;;  %v1430_v55 = vpop.f32.mrf.mxu1  ;;  %v3744_v44 = vld [vmem:[#allocation5 + $0x30] sm:$0xf]  ;;  %v4315_v49 = vld [vmem:[#allocation5 + $0xb4] sm:$0xf0]  ;;  %v3729_v13 = vor.u32 %v4295_v10, %v3728_v8  ;;  %v4298_v10 = vld [vmem:[#allocation5 + $0x34] sm:$0xf] }
  0xf0   :  { %v1726_v29 = vsub.f32 %v1718_v18, %v1722_v19  ;;  %v3745_v46 = vor.u32 %v4299_v45, %v3744_v44  ;;  %v3809_v54 = vor.u32 %v4315_v49, %v3808_v47  ;;  %v4318_v44 = vld [vmem:[#allocation5 + $0xd4] sm:$0xf]  ;;  %v3826_v49 = vld [vmem:[#allocation5 + $0xd8] sm:$0xf0] }
  0xf1   :  { %v1431_v56 = vadd.f32 %v1430_v55, %v1418_v50 }
  0xf2   :  { %v1730_v37 = vmax.f32 %v1726_v29, 0.0  ;;  %2245 = vmatpush.bf16.msra.mxu3 %v3745_v46  ;;  %2258 = vmatpush.bf16.msrb.mxu1 %v3809_v54  ;;  %v3778_v29 = vld [vmem:[#allocation5 + $0x78] sm:$0xf0] }
  0xf4   :  { %v4669_v50 = vadd.f32 1e-05, %v1730_v37  ;;  %v3773_v37 = vor.u32 %v4304_v35, %v3770_v39  ;;  %v3794_v39 = vld [vmem:[#allocation5 + $0x98] sm:$0xf0] }
  0xf6   :  { %v1419_v62 = vpop.f32.mrf.mxu0  ;;  %4399 = vrsqrt.f32 %v4669_v50  ;;  %vm1744_vm7 = vweird.f32 %v4669_v50 }
  0xf7   :  { %v1443_v63 = vpop.f32.mrf.mxu3  ;;  %v1432_v11 = vpop.f32.mrf.mxu1  ;;  %v3737_v62 = vor.u32 %v4297_v58, %v3736_v57  ;;  %v4300_v57 = vld [vmem:[#allocation5 + $0x44] sm:$0xf]  ;;  %v3754_v58 = vld [vmem:[#allocation5 + $0x48] sm:$0xf0] }
  0xf8   :  { %v1444_v0 = vadd.f32 %v1443_v63, %v1431_v56  ;;  %v3800_v63 = vld [vmem:[#allocation5 + $0xa0] sm:$0xf]  ;;  %v3792_v11 = vld [vmem:[#allocation5 + $0x90] sm:$0xf] }
  0xf9   :  { %2246 = vmatpush.bf16.msra.mxu3 %v3737_v62  ;;  %v3793_v16 = vor.u32 %v4311_v14, %v3792_v11  ;;  %v4316_v62 = vld [vmem:[#allocation5 + $0xc4] sm:$0xf]  ;;  %v3746_v11 = vld [vmem:[#allocation5 + $0x38] sm:$0xf0]  ;;  %v4314_v14 = vld [vmem:[#allocation5 + $0xb4] sm:$0xf] }
  0xfa   :  { %v1456_v1 = vpop.f32.mrf.mxu2 }
  0xfb   :  { %v1457_v12 = vadd.f32 %v1456_v1, %v1444_v0  ;;  %v4313_v0 = vld [vmem:[#allocation5 + $0xa4] sm:$0xf0] }
  0xfc   :  { %v3801_v3 = vor.u32 %v4313_v0, %v3800_v63  ;;  %v4682_v17 = vpop.eup %4399  ;;  %v3757_v63 = vor.u32 %v4300_v57, %v3754_v58  ;;  %v3818_v0 = vld [vmem:[#allocation5 + $0xc8] sm:$0xf0] }
  0xfd   :  { %2247 = vmatpush.bf16.msra.mxu3 %v3729_v13  ;;  %vm1745_vm3 = vweird.f32 %v4682_v17  ;;  %v3749_v13 = vor.u32 %v4298_v10, %v3746_v11 }
  0xfe   :  { %v1469_v21 = vpop.f32.mrf.mxu0  ;;  %2259 = vmatpush.bf16.msrb.mxu1 %v3801_v3  ;;  %vm1746_vm8 = vmor %vm1744_vm7, %vm1745_vm3 }
  0xff   :  { %v1445_v22 = vpop.f32.mrf.mxu3  ;;  %v4663_v23 = vadd.f32 %v1469_v21, %v1457_v12  ;;  %v4293_v21 = vld [vmem:[#allocation5 + $0x4] sm:$0xf0] }
 0x100   :  { %v3721_v22 = vor.u32 %v4293_v21, %v3720_v20 }
 0x101   :  { %v1661_v9 = vrot.slane %v4663_v23, 4  ;;  %v1691_v30 = vmul.f32 %v4663_v23, %v4663_v23 }
 0x102   :  { %v1458_v60 = vpop.f32.mrf.mxu2  ;;  %2260 = vmatpush.bf16.msrb.mxu1 %v3793_v16  ;;  %2248 = vmatpush.bf16.msra.mxu3 %v3721_v22 }
 0x103   :  { %v1662_v53 = vadd.f32 %v1661_v9, %v4663_v23  ;;  %v1700_v32 = vrot.slane %v1691_v30, 4  ;;  %v3784_v60 = vld [vmem:[#allocation5 + $0x80] sm:$0xf]  ;;  %v4322_v9 = vld [vmem:[#allocation5 + $0xf4] sm:$0xf] }
 0x104   :  { %v3785_v28 = vor.u32 %v4309_v24, %v3784_v60  ;;  %v4296_v60 = vld [vmem:[#allocation5 + $0x24] sm:$0xf]  ;;  %v3738_v24 = vld [vmem:[#allocation5 + $0x28] sm:$0xf0] }
 0x105   :  { %v1663_v38 = vrot.slane %v1662_v53, 2  ;;  %v1701_v48 = vadd.f32 %v1700_v32, %v1691_v30  ;;  %v1739_v30 = vmul.f32 %v4682_v17, %v4669_v50  ;;  %v3842_v32 = vld [vmem:[#allocation5 + $0xf8] sm:$0xf0] }
 0x106   :  { %v1471_v41 = vpop.f32.mrf.mxu0  ;;  %2261 = vmatpush.bf16.msrb.mxu1 %v3785_v28  ;;  %v3845_v59 = vor.u32 %v4322_v9, %v3842_v32  ;;  %v82_v28 = vld [vmem:[%s4872_s7] sm:$0x77]  ;;  %v3802_v9 = vld [vmem:[#allocation5 + $0xa8] sm:$0xf0]  ;;  %v4294_v32 = vld [vmem:[#allocation5 + $0x14] sm:$0xf] }
 0x107   :  { %v1664_v42 = vadd.f32 %v1663_v38, %v1662_v53  ;;  %v1702_v43 = vrot.slane %v1701_v48, 2  ;;  %v3781_v53 = vor.u32 %v4306_v25, %v3778_v29  ;;  %v3834_v38 = vld [vmem:[#allocation5 + $0xe8] sm:$0xf0]  ;;  %v4312_v25 = vld [vmem:[#allocation5 + $0xa4] sm:$0xf]  ;;  %v3741_v29 = vor.u32 %v4296_v60, %v3738_v24 }
 0x108   :  { %v3837_v40 = vor.u32 %v4320_v36, %v3834_v38 }
 0x109   :  { %v1665_v51 = vrot.slane %v1664_v42, 1  ;;  %v1703_v52 = vadd.f32 %v1702_v43, %v1701_v48  ;;  %2293 = vmatpush.bf16.msrb.mxu3 %v3781_v53  ;;  %v1740_v48 = vmul.f32 %v4682_v17, %v1739_v30  ;;  %v3762_v43 = vld [vmem:[#allocation5 + $0x58] sm:$0xf0]  ;;  %v3805_v30 = vor.u32 %v4312_v25, %v3802_v9 }
 0x10a   :  { %2306 = vmatpush.bf16.msra.mxu1 %v3845_v59  ;;  %v3730_v59 = vld [vmem:[#allocation5 + $0x18] sm:$0xf0] }
 0x10b   :  { %v1666_v55 = vadd.f32 %v1665_v51, %v1664_v42  ;;  %v1704_v56 = vrot.slane %v1703_v52, 1  ;;  %v4302_v42 = vld [vmem:[#allocation5 + $0x54] sm:$0xf]  ;;  %v1741_v51 = vmul.f32 0.5, %v1740_v48  ;;  %v3733_v35 = vor.u32 %v4294_v32, %v3730_v59 }
 0x10c   :  { %v3765_v47 = vor.u32 %v4302_v42, %v3762_v43 }
 0x10d   :  { %v4673_v1 = vmul.f32 %v4655_v61, %v1666_v55  ;;  %v1705_v2 = vadd.f32 %v1704_v56, %v1703_v52  ;;  %2294 = vmatpush.bf16.msrb.mxu3 %v3773_v37  ;;  %v3829_v55 = vor.u32 %v4318_v44, %v3826_v49  ;;  %v4292_v44 = vld [vmem:[#allocation5 + $0x4] sm:$0xf] }
 0x10e   :  { %2307 = vmatpush.bf16.msra.mxu1 %v3837_v40 }
 0x10f   :  { %v1719_v5 = vmul.f32 %v1705_v2, %v4655_v61  ;;  %v1723_v6 = vmul.f32 %v4673_v1, %v4673_v1  ;;  %v4680_v12 = vpop.f32.mrf.mxu1  ;;  %v1742_v2 = vsub.f32 1.5, %v1741_v51 }
 0x111   :  { %v1727_v15 = vsub.f32 %v1719_v5, %v1723_v6  ;;  %2295 = vmatpush.bf16.msrb.mxu3 %v3765_v47  ;;  %v3821_v5 = vor.u32 %v4316_v62, %v3818_v0  ;;  %v1743_v16 = vmul.f32 %v4682_v17, %v1742_v2  ;;  %v3786_v47 = vld [vmem:[#allocation5 + $0x88] sm:$0xf0] }
 0x112   :  { %v4675_v4 = vpop.f32.mrf.mxu0  ;;  %2308 = vmatpush.bf16.msra.mxu1 %v3829_v55 }
 0x113   :  { %v1731_v18 = vmax.f32 %v1727_v15, 0.0  ;;  %v3810_v15 = vld [vmem:[#allocation5 + $0xb8] sm:$0xf0]  ;;  %v1747_v50 = vsel %vm1746_vm8, %v4682_v17, %v1743_v16  ;;  %vm2715_vm8 = vcmask 523264  }
 0x114   :  { %v3813_v21 = vor.u32 %v4314_v14, %v3810_v15 }
 0x115   :  { %v4684_v26 = vadd.f32 1e-05, %v1731_v18  ;;  %2296 = vmatpush.bf16.msrb.mxu3 %v3757_v63 }
 0x116   :  { %2309 = vmatpush.bf16.msra.mxu1 %v3821_v5 }
 0x117   :  { %v1495_v19 = vpop.f32.mrf.mxu3  ;;  %4401 = vrsqrt.f32 %v4684_v26  ;;  %v1484_v34 = vpop.f32.mrf.mxu1  ;;  %vm1754_vm4 = vweird.f32 %v4684_v26 }
 0x118   :  { %v1496_v8 = vadd.f32 %v1495_v19, %v4680_v12  ;;  %v4310_v34 = vld [vmem:[#allocation5 + $0x94] sm:$0xf] }
 0x119   :  { %2297 = vmatpush.bf16.msrb.mxu3 %v3749_v13  ;;  %v3797_v40 = vor.u32 %v4310_v34, %v3794_v39  ;;  %v4339_v39 = vld [vmem:[#allocation5 + $0x174] sm:$0xf0] }
 0x11a   :  { %v4686_v27 = vpop.f32.mrf.mxu2  ;;  %v1510_v31 = vpop.f32.mrf.mxu0  ;;  %v1509_v19 = vadd.f32 %v4675_v4, %v1496_v8  ;;  %2310 = vmatpush.bf16.msra.mxu1 %v3813_v21 }
 0x11c   :  { %v1522_v53 = vadd.f32 %v4686_v27, %v1509_v19  ;;  %v3722_v27 = vld [vmem:[#allocation5 + $0x8] sm:$0xf0] }
 0x11d   :  { %v4402_v45 = vpop.eup %4401  ;;  %2298 = vmatpush.bf16.msrb.mxu3 %v3741_v29 }
 0x11e   :  { %v1749_v52 = vmul.f32 %v4402_v45, %v4684_v26  ;;  %vm1755_vm2 = vweird.f32 %v4402_v45  ;;  %2311 = vmatpush.bf16.msra.mxu1 %v3805_v30 }
 0x11f   :  { %v1497_v41 = vpop.f32.mrf.mxu3  ;;  %vm1756_vm5 = vmor %vm1754_vm4, %vm1755_vm2 }
 0x120   :  { %v1750_v56 = vmul.f32 %v4402_v45, %v1749_v52 }
 0x121   :  { %2299 = vmatpush.bf16.msrb.mxu3 %v3733_v35  ;;  %v3904_v35 = vld [vmem:[#allocation5 + $0x170] sm:$0xf] }
 0x122   :  { %v1523_v46 = vpop.f32.mrf.mxu2  ;;  %v4693_v54 = vpop.f32.mrf.mxu0  ;;  %v1751_v3 = vmul.f32 0.5, %v1750_v56  ;;  %2312 = vmatpush.bf16.msra.mxu1 %v3797_v40 }
 0x123   :  { %v4308_v46 = vld [vmem:[#allocation5 + $0x84] sm:$0xf] }
 0x124   :  { %v1752_v6 = vsub.f32 1.5, %v1751_v3  ;;  %v3789_v55 = vor.u32 %v4308_v46, %v3786_v47  ;;  %v4353_v46 = vld [vmem:[#allocation5 + $0x1e4] sm:$0xf0] }
 0x126   :  { %v1753_v18 = vmul.f32 %v4402_v45, %v1752_v6  ;;  %2313 = vmatpush.bf16.msra.mxu1 %v3789_v55 }
 0x128   :  { %v1757_v12 = vsel %vm1756_vm5, %v4402_v45, %v1753_v18  ;;  %v3725_v45 = vor.u32 %v4292_v44, %v3722_v27 }
 0x129   :  { %v1782_v26 = vrot.slane %v1757_v12, 4 }
 0x12a   :  { %v1562_v20 = vpop.f32.mrf.mxu0  ;;  %2300 = vmatpush.bf16.msrb.mxu3 %v3725_v45  ;;  %v3960_v45 = vld [vmem:[#allocation5 + $0x1e0] sm:$0xf] }
 0x12b   :  { %v1785_v4 = vsel %vm1784_vm6, %v1747_v50, %v1782_v26  ;;  %v3961_v55 = vor.u32 %v4353_v46, %v3960_v45  ;;  %v3848_v45 = vld [vmem:[#allocation5 + $0x100] sm:$0xf]  ;;  %v4325_v46 = vld [vmem:[#allocation5 + $0x104] sm:$0xf0] }
 0x12c   :  { %v1789_v31 = vmul.f32 %v1785_v4, %v82_v28 }
 0x12e   :  { %v1794_v36 = vperm.slane %v1789_v31, 4  ;;  %v1793_v48 = vperm.slane %v1789_v31, 0 }
 0x12f   :  { %v1534_v22 = vpop.f32.mrf.mxu1 }
 0x130   :  { %v1535_v37 = vadd.f32 %v1534_v22, %v1522_v53  ;;  %v1802_v17 = vmul.f32 %v1794_v36, %v4673_v1  ;;  %v1801_v52 = vmul.f32 %v1793_v48, %v4658_v7  ;;  %v1820_v62 = vperm.slane %v1794_v36, 0  ;;  %v3968_v36 = vld [vmem:[#allocation5 + $0x1f0] sm:$0xf] }
 0x131   :  { %v1819_v2 = vperm.slane %v1793_v48, 0  ;;  %v4355_v48 = vld [vmem:[#allocation5 + $0x1f4] sm:$0xf0] }
 0x132   :  { %v1809_v49 = vrot.slane %v1802_v17, 4 }
 0x133   :  { %v1823_v10 = vmul.f32 %v1819_v2, %v4649_v33 }
 0x134   :  { %v1811_v57 = vsel %vm1784_vm6, %v1801_v52, %v1809_v49 }
 0x135   :  { %v1813_v1 = vrot.slane %v1811_v57, 7 }
 0x136   :  { %v1586_v38 = vpop.f32.mrf.mxu0 }
 0x137   :  { %v1547_v41 = vpop.f32.mrf.mxu3  ;;  %v1536_v43 = vpop.f32.mrf.mxu1  ;;  %v1817_v0 = vsub.f32 %v82_v28, %v1813_v1 }
 0x138   :  { %v1548_v42 = vadd.f32 %v1547_v41, %v1535_v37  ;;  %v3905_v37 = vor.u32 %v4339_v39, %v3904_v35  ;;  %v4337_v43 = vld [vmem:[#allocation5 + $0x164] sm:$0xf0] }
 0x139   :  { %v1829_v7 = vperm.slane %v1817_v0, 1  ;;  %v1830_v6 = vperm.slane %v1817_v0, 5  ;;  %v3952_v0 = vld [vmem:[#allocation5 + $0x1d0] sm:$0xf] }
 0x13a   :  { %v1573_v51 = vpop.f32.mrf.mxu2  ;;  %v4713_v56 = vadd.f32 %v4693_v54, %v1548_v42  ;;  %v1824_v54 = vmul.f32 %v1820_v62, %v4663_v23  ;;  %v3969_v42 = vor.u32 %v4355_v48, %v3968_v36  ;;  %2267 = vmatpush.bf16.msrb.mxu2 %v3905_v37  ;;  %v3888_v62 = vld [vmem:[#allocation5 + $0x150] sm:$0xf] }
 0x13b   :  { %v1837_v11 = vperm.slane %v1829_v7, 1  ;;  %v1838_v13 = vperm.slane %v1830_v6, 1  ;;  %v1587_v9 = vadd.f32 %v1586_v38, %v1573_v51  ;;  %v3896_v38 = vld [vmem:[#allocation5 + $0x160] sm:$0xf] }
 0x13c   :  { %v1667_v3 = vrot.slane %v4713_v56, 4  ;;  %v1692_v5 = vmul.f32 %v4713_v56, %v4713_v56  ;;  %2280 = vmatpush.bf16.msra.mxu0 %v3969_v42  ;;  %v3897_v27 = vor.u32 %v4337_v43, %v3896_v38  ;;  %v3920_v42 = vld [vmem:[#allocation5 + $0x190] sm:$0xf]  ;;  %v4343_v43 = vld [vmem:[#allocation5 + $0x194] sm:$0xf0] }
 0x13d   :  { %v1841_v16 = vadd.f32 %v1837_v11, %v1823_v10  ;;  %v1842_v18 = vadd.f32 %v1838_v13, %v1824_v54  ;;  %v3880_v11 = vld [vmem:[#allocation5 + $0x140] sm:$0xf]  ;;  %v4333_v13 = vld [vmem:[#allocation5 + $0x144] sm:$0xf0] }
 0x13e   :  { %v1588_v58 = vpop.f32.mrf.mxu0  ;;  %v1668_v14 = vadd.f32 %v1667_v3, %v4713_v56  ;;  %v1706_v15 = vrot.slane %v1692_v5, 4  ;;  %2268 = vmatpush.bf16.msrb.mxu2 %v3897_v27  ;;  %v4351_v3 = vld [vmem:[#allocation5 + $0x1d4] sm:$0xf0]  ;;  %v3921_v27 = vor.u32 %v4343_v43, %v3920_v42  ;;  %v3930_v42 = vld [vmem:[#allocation5 + $0x1a8] sm:$0xf0] }
 0x13f   :  { %v1549_v63 = vpop.f32.mrf.mxu3  ;;  %v1845_v20 = vmul.f32 0.01, %v1841_v16  ;;  %v1846_v21 = vmul.f32 0.01, %v1842_v18 }
 0x140   :  { %v1669_v12 = vrot.slane %v1668_v14, 2  ;;  %v1707_v19 = vadd.f32 %v1706_v15, %v1692_v5  ;;  %2281 = vmatpush.bf16.msra.mxu0 %v3961_v55  ;;  %v4335_v63 = vld [vmem:[#allocation5 + $0x154] sm:$0xf0]  ;;  %v3944_v15 = vld [vmem:[#allocation5 + $0x1c0] sm:$0xf] }
 0x141   :  { %v1849_v22 = vmax.f32 %v1841_v16, %v1845_v20  ;;  %v1850_v60 = vmax.f32 %v1842_v18, %v1846_v21  ;;  %v3889_v2 = vor.u32 %v4335_v63, %v3888_v62  ;;  %v4349_v16 = vld [vmem:[#allocation5 + $0x1c4] sm:$0xf0]  ;;  %v3906_v62 = vld [vmem:[#allocation5 + $0x178] sm:$0xf0]  ;;  %v4354_v63 = vld [vmem:[#allocation5 + $0x1f4] sm:$0xf] }
 0x142   :  { %v1575_v8 = vpop.f32.mrf.mxu2  ;;  %v1670_v28 = vadd.f32 %v1669_v12, %v1668_v14  ;;  %v1708_v26 = vrot.slane %v1707_v19, 2  ;;  %v3881_v14 = vor.u32 %v4333_v13, %v3880_v11  ;;  %v3945_v12 = vor.u32 %v4349_v16, %v3944_v15  ;;  %v4341_v55 = vld [vmem:[#allocation5 + $0x184] sm:$0xf0]  ;;  %v3890_v15 = vld [vmem:[#allocation5 + $0x158] sm:$0xf0] }
 0x143   :  { %v1853_v24 = vpack.c.bf16 %v1849_v22, %v1849_v22  ;;  %v1854_v25 = vpack.c.bf16 %v1850_v60, %v1850_v60  ;;  %v3953_v8 = vor.u32 %v4351_v3, %v3952_v0  ;;  %2269 = vmatpush.bf16.msrb.mxu2 %v3889_v2  ;;  %v3970_v0 = vld [vmem:[#allocation5 + $0x1f8] sm:$0xf0]  ;;  %v4350_v16 = vld [vmem:[#allocation5 + $0x1d4] sm:$0xf] }
 0x144   :  { %v1671_v33 = vrot.slane %v1670_v28, 1  ;;  %v1709_v29 = vadd.f32 %v1708_v26, %v1707_v19  ;;  %v3936_v26 = vld [vmem:[#allocation5 + $0x1b0] sm:$0xf] }
 0x145   :  { %2249 = vmatmul.bf16.vlgmr.msra.gmra.mxu3 %v1853_v24  ;;  %2262 = vmatmul.bf16.vlgmr.msrb.gmra.mxu1 %v1854_v25 }
 0x146   :  { %v1672_v4 = vadd.f32 %v1671_v33, %v1670_v28  ;;  %v1710_v31 = vrot.slane %v1709_v29, 1  ;;  %2282 = vmatpush.bf16.msra.mxu0 %v3953_v8 }
 0x147   :  { %2270 = vmatpush.bf16.msrb.mxu2 %v3881_v14  ;;  %v4334_v14 = vld [vmem:[#allocation5 + $0x154] sm:$0xf] }
 0x148   :  { %v4723_v40 = vmul.f32 %v4655_v61, %v1672_v4  ;;  %v1711_v41 = vadd.f32 %v1710_v31, %v1709_v29  ;;  %v3864_v31 = vld [vmem:[#allocation5 + $0x120] sm:$0xf] }
 0x14a   :  { %v1720_v47 = vmul.f32 %v1711_v41, %v4655_v61  ;;  %v1724_v49 = vmul.f32 %v4723_v40, %v4723_v40  ;;  %2283 = vmatpush.bf16.msra.mxu0 %v3945_v12  ;;  %v3856_v41 = vld [vmem:[#allocation5 + $0x110] sm:$0xf] }
 0x14c   :  { %v1728_v5 = vsub.f32 %v1720_v47, %v1724_v49  ;;  %v3912_v47 = vld [vmem:[#allocation5 + $0x180] sm:$0xf] }
 0x14e   :  { %v1732_v18 = vmax.f32 %v1728_v5, 0.0  ;;  %v3973_v5 = vor.u32 %v4354_v63, %v3970_v0  ;;  %v4324_v63 = vld [vmem:[#allocation5 + $0x104] sm:$0xf]  ;;  %v3850_v0 = vld [vmem:[#allocation5 + $0x108] sm:$0xf0] }
 0x14f   :  { %v1599_v23 = vpop.f32.mrf.mxu1 }
 0x150   :  { %v1600_v50 = vadd.f32 %v1599_v23, %v1587_v9  ;;  %v4347_v23 = vld [vmem:[#allocation5 + $0x1b4] sm:$0xf0]  ;;  %v4734_v33 = vadd.f32 1e-05, %v1732_v18  ;;  %v3954_v18 = vld [vmem:[#allocation5 + $0x1d8] sm:$0xf0] }
 0x151   :  { %v3957_v12 = vor.u32 %v4350_v16, %v3954_v18 }
 0x152   :  { %4403 = vrsqrt.f32 %v4734_v33  ;;  %vm1764_vm13 = vweird.f32 %v4734_v33 }
 0x155   :  { %2301 = vmatmul.bf16.vlgmr.msrb.gmra.mxu3 %v1853_v24  ;;  %2314 = vmatmul.bf16.vlgmr.msra.gmra.mxu1 %v1854_v25  ;;  %v3872_v24 = vld [vmem:[#allocation5 + $0x130] sm:$0xf]  ;;  %v4331_v25 = vld [vmem:[#allocation5 + $0x134] sm:$0xf0] }
 0x156   :  { %v1638_v30 = vpop.f32.mrf.mxu0  ;;  %v3873_v28 = vor.u32 %v4331_v25, %v3872_v24  ;;  %v4348_v24 = vld [vmem:[#allocation5 + $0x1c4] sm:$0xf]  ;;  %v3946_v25 = vld [vmem:[#allocation5 + $0x1c8] sm:$0xf0] }
 0x157   :  { %v1612_v53 = vpop.f32.mrf.mxu3  ;;  %v1601_v59 = vpop.f32.mrf.mxu1 }
 0x158   :  { %v1613_v32 = vadd.f32 %v1612_v53, %v1600_v50  ;;  %v3937_v50 = vor.u32 %v4347_v23, %v3936_v26  ;;  %2271 = vmatpush.bf16.msrb.mxu2 %v3873_v28  ;;  %v4329_v53 = vld [vmem:[#allocation5 + $0x124] sm:$0xf0]  ;;  %v3928_v59 = vld [vmem:[#allocation5 + $0x1a0] sm:$0xf]  ;;  %v4743_v49 = vpop.eup %4403 }
 0x159   :  { %v1759_v8 = vmul.f32 %v4743_v49, %v4734_v33  ;;  %vm1765_vm10 = vweird.f32 %v4743_v49 }
 0x15a   :  { %v1625_v34 = vpop.f32.mrf.mxu2  ;;  %2284 = vmatpush.bf16.msra.mxu0 %v3937_v50  ;;  %vm1766_vm14 = vmor %vm1764_vm13, %vm1765_vm10 }
 0x15b   :  { %v1626_v17 = vadd.f32 %v1625_v34, %v1613_v32  ;;  %v3865_v32 = vor.u32 %v4329_v53, %v3864_v31  ;;  %v4345_v34 = vld [vmem:[#allocation5 + $0x1a4] sm:$0xf0]  ;;  %v4330_v31 = vld [vmem:[#allocation5 + $0x134] sm:$0xf]  ;;  %v3874_v53 = vld [vmem:[#allocation5 + $0x138] sm:$0xf0] }
 0x15c   :  { %v3929_v36 = vor.u32 %v4345_v34, %v3928_v59  ;;  %v4346_v59 = vld [vmem:[#allocation5 + $0x1b4] sm:$0xf]  ;;  %v3938_v34 = vld [vmem:[#allocation5 + $0x1b8] sm:$0xf0] }
 0x15d   :  { %v1639_v52 = vadd.f32 %v1638_v30, %v1626_v17  ;;  %2272 = vmatpush.bf16.msrb.mxu2 %v3865_v32  ;;  %v4327_v17 = vld [vmem:[#allocation5 + $0x114] sm:$0xf0]  ;;  %v3877_v32 = vor.u32 %v4330_v31, %v3874_v53 }
 0x15e   :  { %v1640_v44 = vpop.f32.mrf.mxu0  ;;  %2285 = vmatpush.bf16.msra.mxu0 %v3929_v36  ;;  %v3857_v38 = vor.u32 %v4327_v17, %v3856_v41  ;;  %v3866_v41 = vld [vmem:[#allocation5 + $0x128] sm:$0xf0]  ;;  %v4344_v17 = vld [vmem:[#allocation5 + $0x1a4] sm:$0xf] }
 0x15f   :  { %v1614_v51 = vpop.f32.mrf.mxu3  ;;  %v1651_v57 = vpop.f32.mrf.mxu1 }
 0x160   :  { %v4728_v1 = vadd.f32 %v1651_v57, %v1639_v52  ;;  %v3849_v52 = vor.u32 %v4325_v46, %v3848_v45  ;;  %v4338_v57 = vld [vmem:[#allocation5 + $0x174] sm:$0xf]  ;;  %v3858_v46 = vld [vmem:[#allocation5 + $0x118] sm:$0xf0] }
 0x161   :  { %2273 = vmatpush.bf16.msrb.mxu2 %v3857_v38  ;;  %v3909_v3 = vor.u32 %v4338_v57, %v3906_v62  ;;  %v83_v38 = vld [vmem:[%s4872_s7 + $0x8] sm:$0x77]  ;;  %v4326_v45 = vld [vmem:[#allocation5 + $0x114] sm:$0xf] }
 0x162   :  { %v1627_v58 = vpop.f32.mrf.mxu2  ;;  %v1673_v7 = vrot.slane %v4728_v1, 4  ;;  %v1693_v6 = vmul.f32 %v4728_v1, %v4728_v1  ;;  %2286 = vmatpush.bf16.msra.mxu0 %v3921_v27  ;;  %v3933_v27 = vor.u32 %v4344_v17, %v3930_v42  ;;  %v3861_v33 = vor.u32 %v4326_v45, %v3858_v46 }
 0x163   :  { %v3913_v58 = vor.u32 %v4341_v55, %v3912_v47 }
 0x164   :  { %v1674_v54 = vadd.f32 %v1673_v7, %v4728_v1  ;;  %v1712_v10 = vrot.slane %v1693_v6, 4  ;;  %v4336_v7 = vld [vmem:[#allocation5 + $0x164] sm:$0xf] }
 0x165   :  { %2274 = vmatpush.bf16.msrb.mxu2 %v3849_v52  ;;  %v3922_v52 = vld [vmem:[#allocation5 + $0x198] sm:$0xf0] }
 0x166   :  { %v1675_v20 = vrot.slane %v1674_v54, 2  ;;  %v1713_v21 = vadd.f32 %v1712_v10, %v1693_v6  ;;  %v3898_v6 = vld [vmem:[#allocation5 + $0x168] sm:$0xf0]  ;;  %2287 = vmatpush.bf16.msra.mxu0 %v3913_v58 }
 0x167   :  { %v1653_v19 = vpop.f32.mrf.mxu1  ;;  %v3962_v10 = vld [vmem:[#allocation5 + $0x1e8] sm:$0xf0]  ;;  %v3901_v11 = vor.u32 %v4336_v7, %v3898_v6 }
 0x168   :  { %v1676_v22 = vadd.f32 %v1675_v20, %v1674_v54  ;;  %v1714_v60 = vrot.slane %v1713_v21, 2  ;;  %v4352_v54 = vld [vmem:[#allocation5 + $0x1e4] sm:$0xf]  ;;  %v1760_v20 = vmul.f32 %v4743_v49, %v1759_v8  ;;  %v3853_v8 = vor.u32 %v4324_v63, %v3850_v0 }
 0x169   :  { %2319 = vmatpush.bf16.msra.mxu2 %v3909_v3  ;;  %v3965_v13 = vor.u32 %v4352_v54, %v3962_v10  ;;  %v4332_v19 = vld [vmem:[#allocation5 + $0x144] sm:$0xf]  ;;  %v3914_v3 = vld [vmem:[#allocation5 + $0x188] sm:$0xf0] }
 0x16a   :  { %v1677_v29 = vrot.slane %v1676_v22, 1  ;;  %v1715_v9 = vadd.f32 %v1714_v60, %v1713_v21  ;;  %2332 = vmatpush.bf16.msrb.mxu0 %v3973_v5  ;;  %v3893_v21 = vor.u32 %v4334_v14, %v3890_v15  ;;  %v3882_v60 = vld [vmem:[#allocation5 + $0x148] sm:$0xf0]  ;;  %v1761_v28 = vmul.f32 0.5, %v1760_v20 }
 0x16c   :  { %v1678_v30 = vadd.f32 %v1677_v29, %v1676_v22  ;;  %v1716_v4 = vrot.slane %v1715_v9, 1  ;;  %v3885_v29 = vor.u32 %v4332_v19, %v3882_v60  ;;  %v1762_v50 = vsub.f32 1.5, %v1761_v28 }
 0x16d   :  { %2320 = vmatpush.bf16.msra.mxu2 %v3901_v11 }
 0x16e   :  { %v4738_v35 = vmul.f32 %v4655_v61, %v1678_v30  ;;  %v1717_v39 = vadd.f32 %v1716_v4, %v1715_v9  ;;  %2333 = vmatpush.bf16.msrb.mxu0 %v3965_v13  ;;  %v3949_v9 = vor.u32 %v4348_v24, %v3946_v25  ;;  %v1763_v36 = vmul.f32 %v4743_v49, %v1762_v50 }
 0x170   :  { %v1721_v37 = vmul.f32 %v1717_v39, %v4655_v61  ;;  %v1725_v48 = vmul.f32 %v4738_v35, %v4738_v35  ;;  %v4328_v39 = vld [vmem:[#allocation5 + $0x124] sm:$0xf]  ;;  %v1767_v55 = vsel %vm1766_vm14, %v4743_v49, %v1763_v36 }
 0x171   :  { %2321 = vmatpush.bf16.msra.mxu2 %v3893_v21 }
 0x172   :  { %v1729_v44 = vsub.f32 %v1721_v37, %v1725_v48  ;;  %2334 = vmatpush.bf16.msrb.mxu0 %v3957_v12  ;;  %v3941_v48 = vor.u32 %v4346_v59, %v3938_v34 }
 0x174   :  { %v1733_v51 = vmax.f32 %v1729_v44, 0.0  ;;  %v3869_v44 = vor.u32 %v4328_v39, %v3866_v41 }
 0x175   :  { %2322 = vmatpush.bf16.msra.mxu2 %v3885_v29 }
 0x176   :  { %v1737_v2 = vadd.f32 1e-05, %v1733_v51  ;;  %2335 = vmatpush.bf16.msrb.mxu0 %v3949_v9  ;;  %v4342_v51 = vld [vmem:[#allocation5 + $0x194] sm:$0xf] }
 0x177   :  { %v3925_v62 = vor.u32 %v4342_v51, %v3922_v52 }
 0x178   :  { %4405 = vrsqrt.f32 %v1737_v2  ;;  %vm1774_vm11 = vweird.f32 %v1737_v2 }
 0x179   :  { %2323 = vmatpush.bf16.msra.mxu2 %v3877_v32 }
 0x17a   :  { %2336 = vmatpush.bf16.msrb.mxu0 %v3941_v48 }
 0x17d   :  { %2324 = vmatpush.bf16.msra.mxu2 %v3869_v44 }
 0x17e   :  { %v4406_v22 = vpop.eup %4405  ;;  %2337 = vmatpush.bf16.msrb.mxu0 %v3933_v27 }
 0x17f   :  { %v1769_v26 = vmul.f32 %v4406_v22, %v1737_v2  ;;  %vm1775_vm9 = vweird.f32 %v4406_v22  ;;  %v4340_v2 = vld [vmem:[#allocation5 + $0x184] sm:$0xf] }
 0x180   :  { %vm1776_vm12 = vmor %vm1774_vm11, %vm1775_vm9  ;;  %v3917_v54 = vor.u32 %v4340_v2, %v3914_v3 }
 0x181   :  { %v1770_v23 = vmul.f32 %v4406_v22, %v1769_v26  ;;  %2325 = vmatpush.bf16.msra.mxu2 %v3861_v33 }
 0x182   :  { %2338 = vmatpush.bf16.msrb.mxu0 %v3925_v62 }
 0x183   :  { %v1771_v30 = vmul.f32 0.5, %v1770_v23 }
 0x185   :  { %v1772_v4 = vsub.f32 1.5, %v1771_v30  ;;  %2326 = vmatpush.bf16.msra.mxu2 %v3853_v8 }
 0x186   :  { %2339 = vmatpush.bf16.msrb.mxu0 %v3917_v54 }
 0x187   :  { %v1773_v37 = vmul.f32 %v4406_v22, %v1772_v4 }
 0x189   :  { %v1777_v43 = vsel %vm1776_vm12, %v4406_v22, %v1773_v37  ;;  %vm2811_vm12 = vcmask 261120  }
 0x18a   :  { %v1783_v47 = vrot.slane %v1777_v43, 4 }
 0x18c   :  { %v1786_v57 = vsel %vm1784_vm6, %v1767_v55, %v1783_v47 }
 0x18d   :  { %v1790_v58 = vmul.f32 %v1786_v57, %v83_v38 }
 0x18f   :  { %v1796_v5 = vperm.slane %v1790_v58, 4  ;;  %v1795_v7 = vperm.slane %v1790_v58, 0 }
 0x191   :  { %v1804_v6 = vmul.f32 %v1796_v5, %v4738_v35  ;;  %v1803_v10 = vmul.f32 %v1795_v7, %v4723_v40  ;;  %v1822_v14 = vperm.slane %v1796_v5, 0  ;;  %v1821_v16 = vperm.slane %v1795_v7, 0 }
 0x193   :  { %v1810_v49 = vrot.slane %v1804_v6, 4  ;;  %v1826_v21 = vmul.f32 %v1822_v14, %v4728_v1  ;;  %v1825_v35 = vmul.f32 %v1821_v16, %v4713_v56  ;;  %v4363_v14 = vld [vmem:[#allocation7 + $0x38] sm:$0xff] }
 0x194   :  { %2570 = vmatpush.bf16.msra.mxu3 %v4363_v14 }
 0x195   :  { %v1812_v11 = vsel %vm1784_vm6, %v1803_v10, %v1810_v49 }
 0x196   :  { %v1814_v13 = vrot.slane %v1812_v11, 7 }
 0x198   :  { %v1818_v15 = vsub.f32 %v83_v38, %v1814_v13 }
 0x19a   :  { %v1831_v18 = vperm.slane %v1818_v15, 1  ;;  %v1832_v20 = vperm.slane %v1818_v15, 5  ;;  %v4371_v15 = vld [vmem:[#allocation7 + $0x78] sm:$0xff] }
 0x19b   :  { %2583 = vmatpush.bf16.msrb.mxu1 %v4371_v15 }
 0x19c   :  { %v1839_v12 = vperm.slane %v1831_v18, 1  ;;  %v1840_v19 = vperm.slane %v1832_v20, 1 }
 0x19e   :  { %v1843_v22 = vadd.f32 %v1839_v12, %v1825_v35  ;;  %v1844_v60 = vadd.f32 %v1840_v19, %v1826_v21  ;;  %v4362_v12 = vld [vmem:[#allocation7 + $0x30] sm:$0xff] }
 0x19f   :  { %v4370_v19 = vld [vmem:[#allocation7 + $0x70] sm:$0xff]  ;;  %2571 = vmatpush.bf16.msra.mxu3 %v4362_v12 }
 0x1a0   :  { %v1847_v24 = vmul.f32 0.01, %v1843_v22  ;;  %v1848_v40 = vmul.f32 0.01, %v1844_v60  ;;  %2584 = vmatpush.bf16.msrb.mxu1 %v4370_v19 }
 0x1a2   :  { %v1851_v25 = vmax.f32 %v1843_v22, %v1847_v24  ;;  %v1852_v28 = vmax.f32 %v1844_v60, %v1848_v40 }
 0x1a4   :  { %v1855_v26 = vpack.c.bf16 %v1851_v25, %v1851_v25  ;;  %v1856_v23 = vpack.c.bf16 %v1852_v28, %v1852_v28  ;;  %v4361_v25 = vld [vmem:[#allocation7 + $0x28] sm:$0xff] }
 0x1a5   :  { %v4369_v28 = vld [vmem:[#allocation7 + $0x68] sm:$0xff]  ;;  %2572 = vmatpush.bf16.msra.mxu3 %v4361_v25  ;;  %v4378_v25 = vld [vmem:[%s4869_s4 + $0x30] sm:$0xff] }
 0x1a6   :  { %2275 = vmatmul.bf16.vlgmr.msrb.gmra.mxu2 %v1855_v26  ;;  %2288 = vmatmul.bf16.vlgmr.msra.gmra.mxu0 %v1856_v23 }
 0x1a7   :  { %2585 = vmatpush.bf16.msrb.mxu1 %v4369_v28 }
 0x1b6   :  { %2327 = vmatmul.bf16.vlgmr.msra.gmra.mxu2 %v1855_v26  ;;  %2340 = vmatmul.bf16.vlgmr.msrb.gmra.mxu0 %v1856_v23 }
 0x1c2   :  { %v2263_v29 = vpop.f32.mrf.mxu1 }
 0x1c8   :  { %v2250_v9 = vpop.f32.mrf.mxu3 }
 0x1c9   :  { %v2264_v50 = vadd.f32 %v2263_v29, %v2250_v9  ;;  %v4360_v9 = vld [vmem:[#allocation7 + $0x20] sm:$0xff] }
 0x1ca   :  { %v2265_v1 = vpop.f32.mrf.mxu1  ;;  %2573 = vmatpush.bf16.msra.mxu3 %v4360_v9 }
 0x1d0   :  { %v2252_v30 = vpop.f32.mrf.mxu3 }
 0x1d2   :  { %v2315_v56 = vpop.f32.mrf.mxu1 }
 0x1d8   :  { %v2302_v4 = vpop.f32.mrf.mxu3 }
 0x1d9   :  { %v2316_v31 = vadd.f32 %v2315_v56, %v2302_v4  ;;  %v4359_v56 = vld [vmem:[#allocation7 + $0x18] sm:$0xff] }
 0x1da   :  { %v2317_v53 = vpop.f32.mrf.mxu1  ;;  %v4367_v4 = vld [vmem:[#allocation7 + $0x58] sm:$0xff]  ;;  %2574 = vmatpush.bf16.msra.mxu3 %v4359_v56 }
 0x1e0   :  { %v2304_v32 = vpop.f32.mrf.mxu3 }
 0x1e1   :  { %v4358_v32 = vld [vmem:[#allocation7 + $0x10] sm:$0xff] }
 0x1e2   :  { %2575 = vmatpush.bf16.msra.mxu3 %v4358_v32 }
 0x223   :  { %v2289_v59 = vpop.f32.mrf.mxu0 }
 0x229   :  { %v2276_v34 = vpop.f32.mrf.mxu2 }
 0x22a   :  { %v2277_v39 = vadd.f32 %v2276_v34, %v2264_v50  ;;  %v4368_v50 = vld [vmem:[#allocation7 + $0x60] sm:$0xff] }
 0x22b   :  { %v2291_v36 = vpop.f32.mrf.mxu0  ;;  %2586 = vmatpush.bf16.msrb.mxu1 %v4368_v50  ;;  %v4377_v50 = vld [vmem:[%s4869_s4 + $0x28] sm:$0xff] }
 0x22c   :  { %v4764_v37 = vadd.f32 %v2289_v59, %v2277_v39  ;;  %v4366_v59 = vld [vmem:[#allocation7 + $0x50] sm:$0xff]  ;;  %v4357_v39 = vld [vmem:[#allocation7 + $0x8] sm:$0xff] }
 0x22d   :  { %v4365_v36 = vld [vmem:[#allocation7 + $0x48] sm:$0xff]  ;;  %2576 = vmatpush.bf16.msra.mxu3 %v4357_v39 }
 0x22e   :  { %v2345_v48 = vrot.slane %v4764_v37, 4  ;;  %v2359_v41 = vmul.f32 %v4764_v37, %v4764_v37 }
 0x22f   :  { %2587 = vmatpush.bf16.msrb.mxu1 %v4367_v4 }
 0x230   :  { %v2346_v17 = vadd.f32 %v2345_v48, %v4764_v37  ;;  %v2361_v42 = vrot.slane %v2359_v41, 4 }
 0x231   :  { %v2278_v38 = vpop.f32.mrf.mxu2 }
 0x232   :  { %v2347_v43 = vrot.slane %v2346_v17, 2  ;;  %v2362_v44 = vadd.f32 %v2361_v42, %v2359_v41  ;;  %v4356_v42 = vld [vmem:[#allocation7] sm:$0xff] }
 0x233   :  { %v2341_v27 = vpop.f32.mrf.mxu0  ;;  %2588 = vmatpush.bf16.msrb.mxu1 %v4366_v59  ;;  %v4364_v38 = vld [vmem:[#allocation7 + $0x40] sm:$0xff]  ;;  %2577 = vmatpush.bf16.msra.mxu3 %v4356_v42 }
 0x234   :  { %v2348_v45 = vadd.f32 %v2347_v43, %v2346_v17  ;;  %v2363_v46 = vrot.slane %v2362_v44, 2 }
 0x236   :  { %v2349_v47 = vrot.slane %v2348_v45, 1  ;;  %v2364_v51 = vadd.f32 %v2363_v46, %v2362_v44 }
 0x237   :  { %2589 = vmatpush.bf16.msrb.mxu1 %v4365_v36  ;;  %v4375_v36 = vld [vmem:[%s4869_s4 + $0x18] sm:$0xff] }
 0x238   :  { %v2350_v52 = vadd.f32 %v2349_v47, %v2348_v45  ;;  %v2365_v55 = vrot.slane %v2364_v51, 1 }
 0x239   :  { %v2328_v57 = vpop.f32.mrf.mxu2 }
 0x23a   :  { %v4771_v58 = vmul.f32 %v2350_v52, %v4655_v61  ;;  %v2366_v33 = vadd.f32 %v2365_v55, %v2364_v51  ;;  %v2329_v62 = vadd.f32 %v2328_v57, %v2316_v31  ;;  %v84_v52 = vld [vmem:[%s4872_s7 + $0x10] sm:$0x77] }
 0x23b   :  { %v2343_v63 = vpop.f32.mrf.mxu0  ;;  %2590 = vmatpush.bf16.msrb.mxu1 %v4364_v38 }
 0x23c   :  { %v2373_v0 = vmul.f32 %v2366_v33, %v4655_v61  ;;  %v2375_v2 = vmul.f32 %v4771_v58, %v4771_v58  ;;  %v4776_v3 = vadd.f32 %v2341_v27, %v2329_v62 }
 0x23e   :  { %v2377_v5 = vsub.f32 %v2373_v0, %v2375_v2  ;;  %v2351_v7 = vrot.slane %v4776_v3, 4  ;;  %v2360_v6 = vmul.f32 %v4776_v3, %v4776_v3 }
 0x240   :  { %v2352_v8 = vadd.f32 %v2351_v7, %v4776_v3  ;;  %v2367_v54 = vrot.slane %v2360_v6, 4  ;;  %v2379_v10 = vmax.f32 %v2377_v5, 0.0 }
 0x241   :  { %v2330_v49 = vpop.f32.mrf.mxu2 }
 0x242   :  { %v2353_v11 = vrot.slane %v2352_v8, 2  ;;  %v2368_v13 = vadd.f32 %v2367_v54, %v2360_v6  ;;  %v2381_v20 = vadd.f32 1e-05, %v2379_v10 }
 0x244   :  { %v2354_v16 = vadd.f32 %v2353_v11, %v2352_v8  ;;  %v2369_v18 = vrot.slane %v2368_v13, 2  ;;  %4407 = vrsqrt.f32 %v2381_v20  ;;  %vm2389_vm3 = vweird.f32 %v2381_v20 }
 0x246   :  { %v2355_v21 = vrot.slane %v2354_v16, 1  ;;  %v2370_v35 = vadd.f32 %v2369_v18, %v2368_v13 }
 0x248   :  { %v2356_v22 = vadd.f32 %v2355_v21, %v2354_v16  ;;  %v2371_v60 = vrot.slane %v2370_v35, 1 }
 0x24a   :  { %v2358_v24 = vmul.f32 %v2356_v22, %v4655_v61  ;;  %v2372_v40 = vadd.f32 %v2371_v60, %v2370_v35  ;;  %v4408_v1 = vpop.eup %4407 }
 0x24b   :  { %v2384_v53 = vmul.f32 %v4408_v1, %v2381_v20  ;;  %vm2390_vm0 = vweird.f32 %v4408_v1 }
 0x24c   :  { %v2374_v26 = vmul.f32 %v2372_v40, %v4655_v61  ;;  %v2376_v23 = vmul.f32 %v2358_v24, %v2358_v24  ;;  %vm2391_vm4 = vmor %vm2389_vm3, %vm2390_vm0  ;;  %vm2892_vm0 = vcmask 80896  }
 0x24d   :  { %v2385_v34 = vmul.f32 %v4408_v1, %v2384_v53  ;;  %v4376_v53 = vld [vmem:[%s4869_s4 + $0x20] sm:$0xff] }
 0x24e   :  { %v2378_v29 = vsub.f32 %v2374_v26, %v2376_v23 }
 0x24f   :  { %v2386_v41 = vmul.f32 0.5, %v2385_v34 }
 0x250   :  { %v2380_v30 = vmax.f32 %v2378_v29, 0.0 }
 0x251   :  { %v2387_v44 = vsub.f32 1.5, %v2386_v41 }
 0x252   :  { %v2382_v31 = vadd.f32 1e-05, %v2380_v30 }
 0x253   :  { %v2388_v46 = vmul.f32 %v4408_v1, %v2387_v44  ;;  %v4373_v44 = vld [vmem:[%s4869_s4 + $0x8] sm:$0xff] }
 0x254   :  { %4409 = vrsqrt.f32 %v2382_v31  ;;  %vm2399_vm1 = vweird.f32 %v2382_v31 }
 0x255   :  { %v2392_v57 = vsel %vm2391_vm4, %v4408_v1, %v2388_v46  ;;  %v4372_v46 = vld [vmem:[%s4869_s4] sm:$0xff] }
 0x25a   :  { %v4410_v48 = vpop.eup %4409 }
 0x25b   :  { %v2394_v17 = vmul.f32 %v4410_v48, %v2382_v31  ;;  %vm2400_vm15 = vweird.f32 %v4410_v48 }
 0x25c   :  { %vm2401_vm2 = vmor %vm2399_vm1, %vm2400_vm15 }
 0x25d   :  { %v2395_v43 = vmul.f32 %v4410_v48, %v2394_v17  ;;  %v4374_v17 = vld [vmem:[%s4869_s4 + $0x10] sm:$0xff] }
 0x25f   :  { %v2396_v27 = vmul.f32 0.5, %v2395_v43 }
 0x261   :  { %v2397_v45 = vsub.f32 1.5, %v2396_v27 }
 0x263   :  { %v2398_v47 = vmul.f32 %v4410_v48, %v2397_v45 }
 0x265   :  { %v2402_v51 = vsel %vm2401_vm2, %v4410_v48, %v2398_v47 }
 0x266   :  { %v2405_v55 = vrot.slane %v2402_v51, 4 }
 0x268   :  { %v2406_v33 = vsel %vm1784_vm6, %v2392_v57, %v2405_v55 }
 0x269   :  { %v2408_v62 = vmul.f32 %v2406_v33, %v84_v52  ;;  %v4821_v33 = vld [vmem:[%s4872_s7 + $0x18] sm:$0x77] }
 0x26b   :  { %v2411_v63 = vperm.slane %v2408_v62, 4  ;;  %v2410_v0 = vperm.slane %v2408_v62, 0 }
 0x26d   :  { %v2415_v2 = vmul.f32 %v2411_v63, %v2358_v24  ;;  %v2424_v5 = vperm.slane %v2411_v63, 0  ;;  %v2414_v7 = vmul.f32 %v2410_v0, %v4771_v58  ;;  %v2423_v6 = vperm.slane %v2410_v0, 0 }
 0x26f   :  { %v2418_v8 = vrot.slane %v2415_v2, 4  ;;  %v2426_v54 = vmul.f32 %v2424_v5, %v4776_v3  ;;  %v2425_v49 = vmul.f32 %v2423_v6, %v4764_v37  ;;  %v4379_v37 = vld [vmem:[%s4869_s4 + $0x38] sm:$0xff] }
 0x270   :  { %2702 = vmatpush.bf16.msrb.mxu2 %v4379_v37 }
 0x271   :  { %v2419_v10 = vsel %vm1784_vm6, %v2414_v7, %v2418_v8 }
 0x272   :  { %v2420_v11 = vrot.slane %v2419_v10, 7 }
 0x274   :  { %v2422_v13 = vsub.f32 %v84_v52, %v2420_v11  ;;  %2703 = vmatpush.bf16.msrb.mxu2 %v4378_v25  ;;  %v4383_v25 = vld [vmem:[%s4870_s5 + $0x18] sm:$0xff] }
 0x275   :  { %2802 = vmatpush.bf16.msra.mxu0 %v4383_v25 }
 0x276   :  { %v2428_v14 = vperm.slane %v2422_v13, 1  ;;  %v2429_v15 = vperm.slane %v2422_v13, 5 }
 0x278   :  { %v2432_v16 = vperm.slane %v2428_v14, 1  ;;  %v2433_v18 = vperm.slane %v2429_v15, 1  ;;  %2704 = vmatpush.bf16.msrb.mxu2 %v4377_v50 }
 0x27a   :  { %v2434_v20 = vadd.f32 %v2432_v16, %v2425_v49  ;;  %v2435_v21 = vadd.f32 %v2433_v18, %v2426_v54 }
 0x27c   :  { %v2436_v35 = vmul.f32 0.01, %v2434_v20  ;;  %v2437_v12 = vmul.f32 0.01, %v2435_v21  ;;  %2705 = vmatpush.bf16.msrb.mxu2 %v4376_v53 }
 0x27e   :  { %v2438_v19 = vmax.f32 %v2434_v20, %v2436_v35  ;;  %v2439_v58 = vmax.f32 %v2435_v21, %v2437_v12 }
 0x280   :  { %v2440_v22 = vpack.c.bf16 %v2438_v19, %v2438_v19  ;;  %v2441_v60 = vpack.c.bf16 %v2439_v58, %v2439_v58  ;;  %2706 = vmatpush.bf16.msrb.mxu2 %v4375_v36 }
 0x282   :  { %2578 = vmatmul.bf16.vlgmr.msra.gmra.mxu3 %v2440_v22  ;;  %2591 = vmatmul.bf16.vlgmr.msrb.gmra.mxu1 %v2441_v60 }
 0x284   :  { %2707 = vmatpush.bf16.msrb.mxu2 %v4374_v17 }
 0x288   :  { %2708 = vmatpush.bf16.msrb.mxu2 %v4373_v44 }
 0x28c   :  { %2709 = vmatpush.bf16.msrb.mxu2 %v4372_v46 }
 0x2ff   :  { %v2592_v3 = vpop.f32.mrf.mxu1 }
 0x305   :  { %v2579_v24 = vpop.f32.mrf.mxu3 }
 0x306   :  { %v2593_v40 = vadd.f32 %v2592_v3, %v2579_v24 }
 0x307   :  { %v2594_v28 = vpop.f32.mrf.mxu1 }
 0x308   :  { %v2596_v26 = vrot.slane %v2593_v40, 4  ;;  %v2603_v23 = vmul.f32 %v2593_v40, %v2593_v40 }
 0x30a   :  { %v2597_v29 = vadd.f32 %v2596_v26, %v2593_v40  ;;  %v2604_v9 = vrot.slane %v2603_v23, 4 }
 0x30c   :  { %v2598_v1 = vrot.slane %v2597_v29, 2  ;;  %v2605_v30 = vadd.f32 %v2604_v9, %v2603_v23  ;;  %v4382_v9 = vld [vmem:[%s4870_s5 + $0x10] sm:$0xff] }
 0x30d   :  { %v2581_v56 = vpop.f32.mrf.mxu3  ;;  %2803 = vmatpush.bf16.msra.mxu0 %v4382_v9 }
 0x30e   :  { %v2599_v4 = vadd.f32 %v2598_v1, %v2597_v29  ;;  %v2606_v31 = vrot.slane %v2605_v30, 2 }
 0x310   :  { %v2600_v32 = vrot.slane %v2599_v4, 1  ;;  %v2607_v59 = vadd.f32 %v2606_v31, %v2605_v30  ;;  %v4381_v30 = vld [vmem:[%s4870_s5 + $0x8] sm:$0xff] }
 0x311   :  { %2804 = vmatpush.bf16.msra.mxu0 %v4381_v30 }
 0x312   :  { %v2601_v34 = vadd.f32 %v2600_v32, %v2599_v4  ;;  %v2608_v39 = vrot.slane %v2607_v59, 1  ;;  %v4380_v4 = vld [vmem:[%s4870_s5] sm:$0xff] }
 0x314   :  { %v2602_v48 = vmul.f32 %v2601_v34, %v4655_v61  ;;  %v2609_v41 = vadd.f32 %v2608_v39, %v2607_v59  ;;  %v2748_v39 = vrot.slane %v4821_v33, 4 }
 0x315   :  { %2805 = vmatpush.bf16.msra.mxu0 %v4380_v4  ;;  %v4423_v4 = vld [vmem:[%s4872_s7] sm:$0x77] }
 0x316   :  { %v2610_v42 = vmul.f32 %v2609_v41, %v4655_v61  ;;  %v2611_v38 = vmul.f32 %v2602_v48, %v2602_v48 }
 0x318   :  { %v2612_v43 = vsub.f32 %v2610_v42, %v2611_v38 }
 0x31a   :  { %v2613_v27 = vmax.f32 %v2612_v43, 0.0 }
 0x31c   :  { %v2614_v45 = vadd.f32 1e-05, %v2613_v27 }
 0x31e   :  { %4411 = vrsqrt.f32 %v2614_v45  ;;  %vm2621_vm6 = vweird.f32 %v2614_v45 }
 0x324   :  { %v4412_v47 = vpop.eup %4411 }
 0x325   :  { %v2616_v51 = vmul.f32 %v4412_v47, %v2614_v45  ;;  %vm2622_vm5 = vweird.f32 %v4412_v47 }
 0x326   :  { %vm2623_vm7 = vmor %vm2621_vm6, %vm2622_vm5 }
 0x327   :  { %v2617_v52 = vmul.f32 %v4412_v47, %v2616_v51 }
 0x329   :  { %v2618_v55 = vmul.f32 0.5, %v2617_v52 }
 0x32b   :  { %v2619_v57 = vsub.f32 1.5, %v2618_v55 }
 0x32d   :  { %v2620_v62 = vmul.f32 %v4412_v47, %v2619_v57 }
 0x32f   :  { %v2624_v63 = vsel %vm2623_vm7, %v4412_v47, %v2620_v62 }
 0x330   :  { %v2625_v0 = vmul.f32 %v2624_v63, %v4821_v33 }
 0x332   :  { %v2626_v2 = vmul.f32 %v2625_v0, %v2602_v48  ;;  %v2631_v5 = vperm.slane %v2625_v0, 0 }
 0x334   :  { %v2628_v7 = vrot.slane %v2626_v2, 7  ;;  %v2632_v8 = vmul.f32 %v2631_v5, %v2593_v40 }
 0x336   :  { %v2630_v6 = vsub.f32 %v4821_v33, %v2628_v7 }
 0x338   :  { %v2633_v54 = vperm.slane %v2630_v6, 1 }
 0x33a   :  { %v2634_v49 = vadd.f32 %v2633_v54, %v2632_v8 }
 0x33c   :  { %v2635_v10 = vmul.f32 0.01, %v2634_v49 }
 0x33e   :  { %v2636_v11 = vmax.f32 %v2634_v49, %v2635_v10 }
 0x340   :  { %v2637_v13 = vpack.c.bf16 %v2636_v11, %v2636_v11 }
 0x342   :  { %2710 = vmatmul.bf16.vlgmr.msrb.gmra.mxu2 %v2637_v13 }
 0x3c5   :  { %v2711_v14 = vpop.f32.mrf.mxu2 }
 0x3c6   :  { %v2716_v15 = vsel %vm2715_vm8, %v2711_v14, 0.0  ;;  %v2724_v16 = vmul.f32 %v2711_v14, %v2711_v14 }
 0x3c7   :  { %v2717_v18 = vrot.slane %v2716_v15, 4 }
 0x3c8   :  { %v2725_v20 = vsel %vm2715_vm8, %v2724_v16, 0.0 }
 0x3c9   :  { %v2718_v21 = vadd.f32 %v2717_v18, %v2716_v15  ;;  %v2726_v35 = vrot.slane %v2725_v20, 4 }
 0x3cb   :  { %v2719_v12 = vrot.slane %v2718_v21, 2  ;;  %v2727_v19 = vadd.f32 %v2726_v35, %v2725_v20 }
 0x3cd   :  { %v2720_v58 = vadd.f32 %v2719_v12, %v2718_v21  ;;  %v2728_v22 = vrot.slane %v2727_v19, 2  ;;  %v2713_v60 = vpop.f32.mrf.mxu2  ;;  %v4385_v21 = vld [vmem:[%s4871_s6 + $0x8] sm:$0xff]  ;;  %v4384_v12 = vld [vmem:[%s4871_s6] sm:$0xff] }
 0x3ce   :  { %2882 = vmatpush.bf16.msrb.mxu3 %v4385_v21 }
 0x3cf   :  { %v2721_v3 = vrot.slane %v2720_v58, 1  ;;  %v2729_v37 = vadd.f32 %v2728_v22, %v2727_v19 }
 0x3d1   :  { %v2722_v24 = vadd.f32 %v2721_v3, %v2720_v58  ;;  %v2730_v40 = vrot.slane %v2729_v37, 1  ;;  %v86_v3 = vld [vmem:[%s4872_s7 + $0x20] sm:$0x7]  ;;  %s4536_s7 = smov [#allocation8]  }
 0x3d2   :  { %2883 = vmatpush.bf16.msrb.mxu3 %v4384_v12  ;;  %s2917_s2 = sshll.u32 %s4536_s7, 4  ;;  %s2918_s2 = int_to_ptr.vmem [resolvable:$true] %s2917_s2 }
 0x3d3   :  { %v2723_v28 = vmul.f32 %v2722_v24, %v4655_v61  ;;  %v2731_v26 = vadd.f32 %v2730_v40, %v2729_v37 }
 0x3d5   :  { %v2732_v23 = vmul.f32 %v2731_v26, %v4655_v61  ;;  %v2733_v29 = vmul.f32 %v2723_v28, %v2723_v28 }
 0x3d7   :  { %v2734_v50 = vsub.f32 %v2732_v23, %v2733_v29 }
 0x3d9   :  { %v2735_v1 = vmax.f32 %v2734_v50, 0.0 }
 0x3db   :  { %v2736_v56 = vadd.f32 1e-05, %v2735_v1 }
 0x3dd   :  { %4413 = vrsqrt.f32 %v2736_v56  ;;  %vm2743_vm10 = vweird.f32 %v2736_v56 }
 0x3e3   :  { %v4414_v31 = vpop.eup %4413 }
 0x3e4   :  { %v2738_v53 = vmul.f32 %v4414_v31, %v2736_v56  ;;  %vm2744_vm9 = vweird.f32 %v4414_v31 }
 0x3e5   :  { %vm2745_vm11 = vmor %vm2743_vm10, %vm2744_vm9 }
 0x3e6   :  { %v2739_v32 = vmul.f32 %v4414_v31, %v2738_v53 }
 0x3e8   :  { %v2740_v59 = vmul.f32 0.5, %v2739_v32 }
 0x3ea   :  { %v2741_v34 = vsub.f32 1.5, %v2740_v59 }
 0x3ec   :  { %v2742_v36 = vmul.f32 %v4414_v31, %v2741_v34 }
 0x3ee   :  { %v2746_v48 = vsel %vm2745_vm11, %v4414_v31, %v2742_v36  ;;  %v2860_v31 = vperm.slane %v4423_v4, 2 }
 0x3ef   :  { %v2750_v41 = vmul.f32 %v2748_v39, %v2746_v48 }
 0x3f1   :  { %v2751_v17 = vmul.f32 %v2750_v41, %v2723_v28  ;;  %v2756_v38 = vperm.slane %v2750_v41, 0 }
 0x3f3   :  { %v2753_v42 = vrot.slane %v2751_v17, 7  ;;  %v2757_v44 = vmul.f32 %v2756_v38, %v2711_v14 }
 0x3f5   :  { %v2755_v43 = vsub.f32 %v2748_v39, %v2753_v42 }
 0x3f7   :  { %v2758_v27 = vperm.slane %v2755_v43, 1 }
 0x3f9   :  { %v2759_v45 = vadd.f32 %v2758_v27, %v2757_v44 }
 0x3fb   :  { %v2760_v46 = vmul.f32 0.01, %v2759_v45 }
 0x3fd   :  { %v2761_v47 = vmax.f32 %v2759_v45, %v2760_v46 }
 0x3ff   :  { %v2762_v51 = vpack.c.bf16 %v2761_v47, %v2761_v47 }
 0x401   :  { %4086 = vmatmul.msk.bf16.vlgmr.msra.gmra.mxu0 %vm2715_vm8, %v2762_v51 }
 0x47e   :  { %v2807_v52 = vpop.f32.mrf.mxu0 }
 0x47f   :  { %v2812_v55 = vsel %vm2811_vm12, %v2807_v52, 0.0  ;;  %v2820_v57 = vmul.f32 %v2807_v52, %v2807_v52 }
 0x480   :  { %v2813_v33 = vrot.slane %v2812_v55, 4 }
 0x481   :  { %v2821_v62 = vsel %vm2811_vm12, %v2820_v57, 0.0 }
 0x482   :  { %v2814_v63 = vadd.f32 %v2813_v33, %v2812_v55  ;;  %v2822_v0 = vrot.slane %v2821_v62, 4 }
 0x484   :  { %v2815_v2 = vrot.slane %v2814_v63, 2  ;;  %v2823_v5 = vadd.f32 %v2822_v0, %v2821_v62 }
 0x486   :  { %v2816_v7 = vadd.f32 %v2815_v2, %v2814_v63  ;;  %v2824_v6 = vrot.slane %v2823_v5, 2  ;;  %v2809_v8 = vpop.f32.mrf.mxu0 }
 0x488   :  { %v2817_v54 = vrot.slane %v2816_v7, 1  ;;  %v2825_v49 = vadd.f32 %v2824_v6, %v2823_v5 }
 0x48a   :  { %v2818_v10 = vadd.f32 %v2817_v54, %v2816_v7  ;;  %v2826_v11 = vrot.slane %v2825_v49, 1 }
 0x48c   :  { %v2819_v13 = vmul.f32 %v2818_v10, %v4655_v61  ;;  %v2827_v14 = vadd.f32 %v2826_v11, %v2825_v49 }
 0x48e   :  { %v2828_v15 = vmul.f32 %v2827_v14, %v4655_v61  ;;  %v2829_v16 = vmul.f32 %v2819_v13, %v2819_v13 }
 0x490   :  { %v2830_v18 = vsub.f32 %v2828_v15, %v2829_v16 }
 0x492   :  { %v2831_v20 = vmax.f32 %v2830_v18, 0.0 }
 0x494   :  { %v2832_v35 = vadd.f32 1e-05, %v2831_v20 }
 0x496   :  { %4415 = vrsqrt.f32 %v2832_v35  ;;  %vm2839_vm14 = vweird.f32 %v2832_v35 }
 0x49c   :  { %v4416_v19 = vpop.eup %4415 }
 0x49d   :  { %v2834_v58 = vmul.f32 %v4416_v19, %v2832_v35  ;;  %vm2840_vm13 = vweird.f32 %v4416_v19 }
 0x49e   :  { %vm2841_vm15 = vmor %vm2839_vm14, %vm2840_vm13 }
 0x49f   :  { %v2835_v22 = vmul.f32 %v4416_v19, %v2834_v58 }
 0x4a1   :  { %v2836_v60 = vmul.f32 0.5, %v2835_v22 }
 0x4a3   :  { %v2837_v61 = vsub.f32 1.5, %v2836_v60 }
 0x4a5   :  { %v2838_v37 = vmul.f32 %v4416_v19, %v2837_v61 }
 0x4a7   :  { %v2842_v24 = vsel %vm2841_vm15, %v4416_v19, %v2838_v37 }
 0x4a8   :  { %v2843_v40 = vmul.f32 %v2842_v24, %v86_v3 }
 0x4aa   :  { %v2844_v25 = vmul.f32 %v2843_v40, %v2819_v13  ;;  %v2849_v26 = vperm.slane %v2843_v40, 0 }
 0x4ac   :  { %v2846_v28 = vrot.slane %v2844_v25, 7  ;;  %v2850_v29 = vmul.f32 %v2849_v26, %v2807_v52 }
 0x4ae   :  { %v2848_v23 = vsub.f32 %v86_v3, %v2846_v28 }
 0x4b0   :  { %v2851_v9 = vperm.slane %v2848_v23, 1 }
 0x4b2   :  { %v2852_v50 = vadd.f32 %v2851_v9, %v2850_v29 }
 0x4b4   :  { %v2853_v1 = vmul.f32 0.01, %v2852_v50 }
 0x4b6   :  { %v2854_v30 = vmax.f32 %v2852_v50, %v2853_v1 }
 0x4b8   :  { %v2855_v56 = vpack.c.bf16 %v2854_v30, %v2854_v30 }
 0x4ba   :  { %4095 = vmatmul.msk.bf16.vlgmr.msrb.gmra.mxu3 %vm2811_vm12, %v2855_v56 }
 0x53d   :  { %v2885_v53 = vpop.f32.mrf.mxu3 }
 0x53e   :  { %v2886_v32 = vadd.f32 %v2885_v53, %v2860_v31 }
 0x540   :  { %4417 = vtanh.f32 %v2886_v32 }
 0x545   :  { %v2887_v59 = vpop.f32.mrf.mxu3 }
 0x546   :  { %v4418_v34 = vpop.eup %4417 }
 0x547   :  { %v2890_v39 = vmul.f32 1.442695, %v4418_v34 }
 0x549   :  { %4419 = vpow2.f32 %v2890_v39 }
 0x54f   :  { %v4420_v36 = vpop.eup %4419 }
 0x550   :  { %v2893_v48 = vsel %vm2892_vm0, %v4420_v36, 0.0 }
 0x551   :  { %2894 = vadd.xlane.f32.xlu0 %v2893_v48 }
 0x5c4   :  { %v2895_v41 = vpop.xlane.xlu0 %2894 }
 0x5c5   :  { %4421 = vrcp.f32 %v2895_v41  ;;  %v2907_v43 = vand.u32 2147483648, %v2895_v41  ;;  %v2905_v27 = vand.u32 2147483647, %v2895_v41  ;;  %vm2901_vm2 = vweird.f32 %v2895_v41 }
 0x5c7   :  { %v2908_v46 = vor.u32 1.1754944e-38, %v2907_v43  ;;  %vm2906_vm4 = vcmp.eq.f32.partialorder %v2905_v27, 8.507059e+37 }
 0x5cb   :  { %v4422_v17 = vpop.eup %4421 }
 0x5cc   :  { %v2897_v42 = vmul.f32 %v4422_v17, %v2895_v41  ;;  %vm2902_vm1 = vweird.f32 %v4422_v17 }
 0x5cd   :  { %vm2903_vm3 = vmor %vm2901_vm2, %vm2902_vm1 }
 0x5ce   :  { %v2898_v38 = vsub.f32 1.0, %v2897_v42 }
 0x5d0   :  { %v2899_v44 = vmul.f32 %v4422_v17, %v2898_v38 }
 0x5d2   :  { %v2900_v45 = vadd.f32 %v4422_v17, %v2899_v44 }
 0x5d4   :  { %v2904_v47 = vsel %vm2903_vm3, %v4422_v17, %v2900_v45 }
 0x5d5   :  { %v2909_v51 = vsel %vm2906_vm4, %v2908_v46, %v2904_v47 }
 0x5d6   :  { %v2910_v52 = vmul.f32 %v4420_v36, %v2909_v51 }
 0x5d8   :  { %2911 = vst.msk [vmem:[#allocation8] sm:$0xff] %vm2892_vm0, %v2910_v52 }
 0x5d9   :  { %2922 = dma.vmem_to_hbm [thread:$0]  %s2918_s2, 128, %s2920_s21, [#allocation4]  }
 0x5da   :  { %4524 = dma.done.wait [#allocation4], 128  }
 0x5db   :  { %4525 = vsyncadd [#allocation4], 4294967168 }
 0x5dc   :  { %2927 = vsyncpa [#allocation3], 1 }
 0x5dd   :  { %2928 = vsyncpa [#allocation6], 1 }
 0x5de   :  { %2929 = vsyncpa [#allocation4], 1 }

</bundles_post_ra>
